<compile_context>
chip_gen: v5e
topology: v5e:2x2
jax: 0.10.0
libtpu: 0.0.40
codegen_flags: <defaults>
</compile_context>

<pallas_src>
import functools

import jax
import jax.numpy as jnp
from jax.experimental import pallas as pl
from jax.experimental.pallas import tpu as pltpu

_BN_EPS = 1e-5
_LANE = 128


def _relu6(v):
    return jnp.clip(v, 0.0, 6.0)


def _rup(x, m=_LANE):
    return ((x + m - 1) // m) * m


# ------------------------------ fused kernel -------------------------------- #

def fused_block_kernel(x_ref, w1_ref, b1_ref, w2_ref, b2_ref, wp_ref, b3_ref,
                       o_ref, hpad_ref, *, stride, shortcut, true_w, bottom_pad):
    """One (batch, H-tile) step of the inverted-residual block.

    x_ref    : (H+2, W_p, Cin)        bf16  spatially + channel padded input
    w1_ref   : (Cin, Cmid)            bf16  expand 1x1, BN1 scale folded in
    b1_ref   : (1, Cmid)              f32   BN1 bias
    w2_ref   : (9, Cmid)              f32   depthwise 3x3 (kh*3+kw), BN2 folded
    b2_ref   : (1, Cmid)              f32   BN2 bias
    wp_ref   : (Cmid[+Cin], Cout)     bf16  project 1x1 (stacked with shortcut
                                            1x1 when shortcut == "conv")
    b3_ref   : (1, Cout)              f32   BN3 (+BNsc) bias
    o_ref    : (TH, W_out, Cout)      f32   output tile
    hpad_ref : (TH_in, W_p, Cmid)     bf16  VMEM scratch: padded expanded tile
    """
    TH, W_out, Cout = o_ref.shape
    TH_in, W_p, Cmid = hpad_ref.shape
    Cin = x_ref.shape[-1]
    core_rows = TH * stride

    h_idx = pl.program_id(1)
    row0 = h_idx * core_rows                       # first padded-image row of tile
    if core_rows & (core_rows - 1) == 0:
        row0 = pl.multiple_of(row0, core_rows)

    # --- stage 1: expand 1x1 (+BN1+ReLU6) for ALL halo-inclusive rows ---------
    # One MXU call, one aligned full-scratch store (no zero fill of the interior).
    xw = x_ref[pl.ds(row0, TH_in), :, :]                       # (TH_in, W_p, Cin) bf16
    h1 = jnp.dot(xw.reshape(TH_in * W_p, Cin), w1_ref[...],
                 preferred_element_type=jnp.float32)
    h1 = _relu6(h1 + b1_ref[...])
    hpad_ref[...] = h1.reshape(TH_in, W_p, Cmid).astype(hpad_ref.dtype)

    # Zero only the depthwise-padding border that the taps actually read.
    zcol = jnp.zeros((TH_in, 1, Cmid), hpad_ref.dtype)
    hpad_ref[:, 0:1, :] = zcol                                 # left pad column
    hpad_ref[:, true_w + 1:true_w + 2, :] = zcol               # right pad column
    zrow = jnp.zeros((1, W_p, Cmid), hpad_ref.dtype)

    @pl.when(h_idx == 0)                                       # image-top pad row
    def _():
        hpad_ref[0:1, :, :] = zrow

    if bottom_pad:                                             # image-bottom pad row
        @pl.when(h_idx == pl.num_programs(1) - 1)
        def _():
            hpad_ref[TH_in - 1:TH_in, :, :] = zrow

    # --- stage 2: depthwise 3x3 (+BN2+ReLU6); bf16 taps, f32 accumulation -----
    w2 = w2_ref[...]                                           # (9, Cmid) f32
    acc = jnp.zeros((TH, W_out, Cmid), jnp.float32)
    if stride == 1:
        # Direct ref loads (3 vld slots) instead of materializing the scratch.
        for kh in range(3):
            for kw in range(3):
                patch = hpad_ref[kh:kh + TH, kw:kw + W_out, :]
                acc = acc + patch * w2[kh * 3 + kw].reshape(1, 1, Cmid)
    else:
        # TODO(synk): stride-2 path keeps the value strided-slice formulation;
        # it is not exercised by the tests below.
        hp = hpad_ref[...]
        for kh in range(3):
            for kw in range(3):
                patch = hp[kh:kh + (TH - 1) * stride + 1:stride,
                           kw:kw + (W_out - 1) * stride + 1:stride, :]
                acc = acc + patch * w2[kh * 3 + kw].reshape(1, 1, Cmid)
    h2 = _relu6(acc + b2_ref[...])

    # --- stage 3: project 1x1 (+BN3), fused with the shortcut -----------------
    h2_2d = h2.reshape(TH * W_out, Cmid).astype(jnp.bfloat16)
    if shortcut == "conv":
        # Shortcut 1x1 fused into the same MXU call: K = Cmid + Cin.
        x_sc = x_ref[pl.ds(row0 + 1, TH), 1:true_w + 1, :]     # (TH, W, Cin) bf16
        lhs = jnp.concatenate([h2_2d, x_sc.reshape(TH * W_out, Cin)], axis=1)
    else:
        lhs = h2_2d
    out = jnp.dot(lhs, wp_ref[...], preferred_element_type=jnp.float32) + b3_ref[...]
    if shortcut == "identity":                                 # Cin == Cout here
        x_sc = x_ref[pl.ds(row0 + 1, TH), 1:true_w + 1, :]
        out = out + x_sc.reshape(TH * W_out, Cin).astype(jnp.float32)
    o_ref[...] = out.reshape(TH, W_out, Cout).astype(o_ref.dtype)


# ------------------------------- parameters --------------------------------- #

def init_block_params(key, in_planes, out_planes, expansion, use_conv_shortcut):
    """Raw (PyTorch-equivalent) parameters: conv weights + BN running stats."""
    planes = expansion * in_planes
    ks = jax.random.split(key, 8)

    def bn_params(k, c):
        k1, k2, k3, k4 = jax.random.split(k, 4)
        return {"gamma": 0.5 + jax.random.uniform(k1, (c,), jnp.float32),
                "beta": 0.1 * jax.random.normal(k2, (c,), jnp.float32),
                "mean": 0.1 * jax.random.normal(k3, (c,), jnp.float32),
                "var": 0.5 + jax.random.uniform(k4, (c,), jnp.float32)}

    p = {
        # conv1 (planes, in, 1, 1) stored transposed as (in, planes)
        "w1": 0.2 * jax.random.normal(ks[0], (in_planes, planes), jnp.float32),
        "bn1": bn_params(ks[1], planes),
        # conv2 depthwise (planes, 1, 3, 3) stored as (9, planes), index kh*3+kw
        "w2": 0.2 * jax.random.normal(ks[2], (9, planes), jnp.float32),
        "bn2": bn_params(ks[3], planes),
        # conv3 (out, planes, 1, 1) stored transposed as (planes, out)
        "w3": 0.2 * jax.random.normal(ks[4], (planes, out_planes), jnp.float32),
        "bn3": bn_params(ks[5], out_planes),
    }
    if use_conv_shortcut:
        p["wsc"] = 0.2 * jax.random.normal(ks[6], (in_planes, out_planes), jnp.float32)
        p["bnsc"] = bn_params(ks[7], out_planes)
    return p


def _fold(bn):
    scale = bn["gamma"] / jnp.sqrt(bn["var"] + _BN_EPS)
    bias = bn["beta"] - bn["mean"] * scale
    return scale, bias


def _pad2(a, rows, cols):
    return jnp.pad(a, ((0, rows - a.shape[0]), (0, cols - a.shape[1])))


def _use_conv_shortcut(in_planes, out_planes, stride, flag):
    return (flag == 0 and stride == 1 and in_planes != out_planes) or flag == 1


def prepare_kernel_params(raw, *, in_planes, out_planes, planes, stride, flag):
    """Fold BN scales into conv weights, zero-pad channels to 128 multiples,
    cast MXU (1x1) weights to bf16, and pre-stack [w3; wsc] for the fused
    project+shortcut dot when the conv shortcut is actually added (stride 1)."""
    Cin_p, Cmid_p, Cout_p = _rup(in_planes), _rup(planes), _rup(out_planes)
    s1, b1 = _fold(raw["bn1"])
    s2, b2 = _fold(raw["bn2"])
    s3, b3 = _fold(raw["bn3"])
    w3 = _pad2(raw["w3"] * s3[None, :], Cmid_p, Cout_p)
    b3p = _pad2(b3[None, :], 1, Cout_p)
    fuse_sc = _use_conv_shortcut(in_planes, out_planes, stride, flag) and stride == 1
    if fuse_sc:
        ssc, bsc = _fold(raw["bnsc"])
        wsc = _pad2(raw["wsc"] * ssc[None, :], Cin_p, Cout_p)
        wproj = jnp.concatenate([w3, wsc], axis=0)             # (Cmid_p + Cin_p, Cout_p)
        b3p = b3p + _pad2(bsc[None, :], 1, Cout_p)
    else:
        wproj = w3
    return {
        "w1": _pad2(raw["w1"] * s1[None, :], Cin_p, Cmid_p).astype(jnp.bfloat16),
        "b1": _pad2(b1[None, :], 1, Cmid_p),
        "w2": _pad2(raw["w2"] * s2[None, :], 9, Cmid_p),       # f32 (VPU path)
        "b2": _pad2(b2[None, :], 1, Cmid_p),
        "wp": wproj.astype(jnp.bfloat16),
        "b3": b3p,
    }


# --------------------------------- forward ---------------------------------- #

def block_forward(x_nchw, kparams, *, in_planes, out_planes, expansion, stride,
                  flag, th_cap=32):
    N, C, H, W = x_nchw.shape
    assert C == in_planes
    planes = expansion * in_planes
    use_conv = _use_conv_shortcut(in_planes, out_planes, stride, flag)
    if stride != 1:
        # TODO(synk): PyTorch still evaluates cc = self.shortcut(x) and numpy
        # count_nonzero stats here; they do not affect the returned value.
        shortcut = "none"
    elif use_conv:
        shortcut = "conv"
    else:
        shortcut = "identity"
        assert in_planes == out_planes, "identity shortcut needs in == out planes"

    Cin_p, Cmid_p, Cout_p = _rup(in_planes), _rup(planes), _rup(out_planes)
    H_out = (H - 1) // stride + 1
    W_out = (W - 1) // stride + 1
    W_p = _rup(W + 2, 16)            # bf16-tile aligned scratch / x width

    # Output-row tile: largest divisor of H_out under the cap, shrunk if the
    # VMEM footprint (scratch + double-buffered out tile + x block) is too big.
    TH = min(H_out, th_cap)
    while H_out % TH:
        TH -= 1

    def _footprint(th):
        th_in = (th - 1) * stride + 3
        return (th_in * W_p * Cmid_p * 2            # bf16 scratch
                + 2 * th * W_out * Cout_p * 4       # double-buffered out tile
                + 2 * (H + 2) * W_p * Cin_p * 2)    # double-buffered x block

    while TH > 1 and _footprint(TH) > 12 * 1024 * 1024:
        TH -= 1
        while H_out % TH:
            TH -= 1
    n_h = H_out // TH
    TH_in = (TH - 1) * stride + 3
    bottom_pad = ((H_out - 1) * stride + 2 == H + 1)

    # NCHW -> NHWC bf16, spatially padded for the depthwise halo (1 top/bottom
    # row, 1 left col, right cols up to W_p), channels padded to 128 multiples.
    # TODO(synk): in a full network keep activations NHWC / bf16 / channel-padded
    # end-to-end so these wrapper-side layout passes (transpose/pad/slice) vanish.
    x = jnp.transpose(x_nchw, (0, 2, 3, 1)).astype(jnp.bfloat16)
    x = jnp.pad(x, ((0, 0), (1, 1), (1, W_p - W - 1), (0, Cin_p - in_planes)))

    p = kparams
    args = [x, p["w1"], p["b1"], p["w2"], p["b2"], p["wp"], p["b3"]]
    Kproj = p["wp"].shape[0]
    in_specs = [
        # TODO(synk): for full-size feature maps (56x56+, Cin >= 128) window the
        # input over H via manual DMA (memory_space=pl.ANY) instead of mapping
        # the whole image per batch; not needed at these test shapes.
        pl.BlockSpec((None, H + 2, W_p, Cin_p), lambda n, h: (n, 0, 0, 0)),
        pl.BlockSpec((Cin_p, Cmid_p), lambda n, h: (0, 0)),
        pl.BlockSpec((1, Cmid_p), lambda n, h: (0, 0)),
        pl.BlockSpec((9, Cmid_p), lambda n, h: (0, 0)),
        pl.BlockSpec((1, Cmid_p), lambda n, h: (0, 0)),
        pl.BlockSpec((Kproj, Cout_p), lambda n, h: (0, 0)),
        pl.BlockSpec((1, Cout_p), lambda n, h: (0, 0)),
    ]

    kernel = functools.partial(fused_block_kernel, stride=stride, shortcut=shortcut,
                               true_w=W, bottom_pad=bottom_pad)

    out_padded = pl.pallas_call(
        kernel,
        grid=(N, n_h),
        in_specs=in_specs,
        out_specs=pl.BlockSpec((None, TH, W_out, Cout_p), lambda n, h: (n, h, 0, 0)),
        out_shape=jax.ShapeDtypeStruct((N, H_out, W_out, Cout_p), jnp.float32),
        scratch_shapes=[pltpu.VMEM((TH_in, W_p, Cmid_p), jnp.bfloat16)],
        compiler_params=pltpu.CompilerParams(
            dimension_semantics=("parallel", "parallel"),
            vmem_limit_bytes=32 * 1024 * 1024),
    )(*args)

    out = out_padded[..., :out_planes]
    return jnp.transpose(out, (0, 3, 1, 2))     # back to NCHW


# -------------------------- pure-JAX f32 reference -------------------------- #

def block_forward_ref(x_nchw, raw, *, in_planes, out_planes, expansion, stride, flag):
    planes = expansion * in_planes
    use_conv = _use_conv_shortcut(in_planes, out_planes, stride, flag)
    N, C, H, W = x_nchw.shape
    x = jnp.transpose(x_nchw, (0, 2, 3, 1)).astype(jnp.float32)

    def bn(v, p):
        return (v - p["mean"]) / jnp.sqrt(p["var"] + _BN_EPS) * p["gamma"] + p["beta"]

    h = _relu6(bn(x @ raw["w1"], raw["bn1"]))
    xp = jnp.pad(h, ((0, 0), (1, 1), (1, 1), (0, 0)))
    H_out = (H - 1) // stride + 1
    W_out = (W - 1) // stride + 1
    acc = jnp.zeros((N, H_out, W_out, planes), jnp.float32)
    for kh in range(3):
        for kw in range(3):
            patch = xp[:, kh:kh + (H_out - 1) * stride + 1:stride,
                          kw:kw + (W_out - 1) * stride + 1:stride, :]
            acc = acc + patch * raw["w2"][kh * 3 + kw]
    h2 = _relu6(bn(acc, raw["bn2"]))
    out = bn(h2 @ raw["w3"], raw["bn3"])
    if stride == 1:
        if use_conv:
            out = out + bn(x @ raw["wsc"], raw["bnsc"])
        else:
            out = out + x
    return jnp.transpose(out, (0, 3, 1, 2))


# ----------------------------------- main ------------------------------------ #

def _run_case(key, *, in_planes, out_planes, expansion, stride, flag, th_cap=32):
    N, H, W = 2, 16, 16
    kx, kp = jax.random.split(key)
    x = jax.random.normal(kx, (N, in_planes, H, W), jnp.float32)
    use_conv = _use_conv_shortcut(in_planes, out_planes, stride, flag)
    raw = init_block_params(kp, in_planes, out_planes, expansion, use_conv)
    kparams = prepare_kernel_params(raw, in_planes=in_planes, out_planes=out_planes,
                                    planes=expansion * in_planes,
                                    stride=stride, flag=flag)
    out = block_forward(x, kparams, in_planes=in_planes, out_planes=out_planes,
                        expansion=expansion, stride=stride, flag=flag, th_cap=th_cap)
    out = jax.block_until_ready(out)
    ref = block_forward_ref(x, raw, in_planes=in_planes, out_planes=out_planes,
                            expansion=expansion, stride=stride, flag=flag)
    H_out = (H - 1) // stride + 1
    W_out = (W - 1) // stride + 1
    assert out.shape == (N, out_planes, H_out, W_out), out.shape
    err = float(jnp.max(jnp.abs(out - ref)))
    # bf16 matmul / activation path (f32 accumulation) vs. the pure-f32 reference.
    assert jnp.allclose(out, ref, atol=5e-2, rtol=5e-2), f"max abs err {err}"


if __name__ == "__main__":
    key = jax.random.PRNGKey(0)
    k1, k2, k3 = jax.random.split(key, 3)
    # conv-1x1 + BN shortcut path, 2 H-tiles (exercises the halo recompute).
    _run_case(k1, in_planes=4, out_planes=8, expansion=6, stride=1, flag=0, th_cap=8)
    # identity shortcut path, single H-tile.
    _run_case(k2, in_planes=8, out_planes=8, expansion=6, stride=1, flag=0)
    # flag=1: conv shortcut forced even though in_planes == out_planes.
    _run_case(k3, in_planes=8, out_planes=8, expansion=4, stride=1, flag=1)
    print("KERNEL_OK")
</pallas_src>

<mosaic_0001>
module attributes {stable_mosaic.version = 11 : i64} {
  func.func @fused_block_kernel(%arg0: i32, %arg1: i32, %arg2: memref<1x18x32x128xbf16, #tpu.memory_space<vmem>>, %arg3: memref<128x128xbf16, #tpu.memory_space<vmem>>, %arg4: memref<1x128xf32, #tpu.memory_space<vmem>>, %arg5: memref<9x128xf32, #tpu.memory_space<vmem>>, %arg6: memref<1x128xf32, #tpu.memory_space<vmem>>, %arg7: memref<256x128xbf16, #tpu.memory_space<vmem>>, %arg8: memref<1x128xf32, #tpu.memory_space<vmem>>, %arg9: memref<1x8x16x128xf32, #tpu.memory_space<vmem>>, %arg10: memref<10x32x128xbf16, #tpu.memory_space<vmem>>) attributes {dimension_semantics = [#tpu.dimension_semantics<parallel>, #tpu.dimension_semantics<parallel>], iteration_bounds = array<i64: 2, 2>, scalar_prefetch = 0 : i64, scratch_operands = 1 : i64, tpu.core_type = #tpu.core_type<tc>, window_params = [{transform_indices = @transform_0, window_bounds = array<i64: 1, 18, 32, 128>}, {pipeline_mode = #tpu.pipeline_mode<synchronous>, transform_indices = @transform_1, window_bounds = array<i64: 128, 128>}, {pipeline_mode = #tpu.pipeline_mode<synchronous>, transform_indices = @transform_2, window_bounds = array<i64: 1, 128>}, {pipeline_mode = #tpu.pipeline_mode<synchronous>, transform_indices = @transform_3, window_bounds = array<i64: 9, 128>}, {pipeline_mode = #tpu.pipeline_mode<synchronous>, transform_indices = @transform_4, window_bounds = array<i64: 1, 128>}, {pipeline_mode = #tpu.pipeline_mode<synchronous>, transform_indices = @transform_5, window_bounds = array<i64: 256, 128>}, {pipeline_mode = #tpu.pipeline_mode<synchronous>, transform_indices = @transform_6, window_bounds = array<i64: 1, 128>}, {transform_indices = @transform_7, window_bounds = array<i64: 1, 8, 16, 128>}]} {
    %c8_i32 = arith.constant 8 : i32
    %0 = arith.muli %arg1, %c8_i32 : i32
    %1 = tpu.assume_multiple %0, 8 : i32
    %c0 = arith.constant 0 : index
    %2 = arith.index_cast %1 : i32 to index
    %c0_0 = arith.constant 0 : index
    %c0_1 = arith.constant 0 : index
    %3 = vector.load %arg2[%c0, %2, %c0_0, %c0_1] : memref<1x18x32x128xbf16, #tpu.memory_space<vmem>>, vector<1x10x32x128xbf16>
    %4 = vector.shape_cast %3 : vector<1x10x32x128xbf16> to vector<10x32x128xbf16>
    %5 = vector.shape_cast %4 : vector<10x32x128xbf16> to vector<320x128xbf16>
    %c0_2 = arith.constant 0 : index
    %c0_3 = arith.constant 0 : index
    %6 = vector.load %arg3[%c0_2, %c0_3] : memref<128x128xbf16, #tpu.memory_space<vmem>>, vector<128x128xbf16>
    %cst = arith.constant dense<0.000000e+00> : vector<320x128xf32>
    %7 = tpu.matmul %5, %6, %cst {dimension_numbers = #tpu.dot_dimension_numbers<[1], [0], [0], [1], [0, 0, 1, 1], [], []>} : vector<320x128xbf16>, vector<128x128xbf16>, vector<320x128xf32> -> vector<320x128xf32>
    %c0_4 = arith.constant 0 : index
    %c0_5 = arith.constant 0 : index
    %8 = vector.load %arg4[%c0_4, %c0_5] : memref<1x128xf32, #tpu.memory_space<vmem>>, vector<1x128xf32>
    %9 = vector.broadcast %8 : vector<1x128xf32> to vector<320x128xf32>
    %10 = arith.addf %7, %9 : vector<320x128xf32>
    %cst_6 = arith.constant 0.000000e+00 : f32
    %cst_7 = arith.constant 6.000000e+00 : f32
    %11 = vector.broadcast %cst_6 : f32 to vector<320x128xf32>
    %12 = arith.maximumf %11, %10 : vector<320x128xf32>
    %13 = vector.broadcast %cst_7 : f32 to vector<320x128xf32>
    %14 = arith.minimumf %13, %12 : vector<320x128xf32>
    %15 = vector.shape_cast %14 : vector<320x128xf32> to vector<10x32x128xf32>
    %16 = arith.truncf %15 : vector<10x32x128xf32> to vector<10x32x128xbf16>
    %c0_8 = arith.constant 0 : index
    %c0_9 = arith.constant 0 : index
    %c0_10 = arith.constant 0 : index
    %17 = vector.load %arg10[%c0_8, %c0_9, %c0_10] : memref<10x32x128xbf16, #tpu.memory_space<vmem>>, vector<10x32x128xbf16>
    tpu.vector_store %arg10[%c0_8, %c0_9, %c0_10], %16 {strides = array<i32>} : memref<10x32x128xbf16, #tpu.memory_space<vmem>>, vector<10x32x128xbf16>,
    %cst_11 = arith.constant 0.000000e+00 : bf16
    %18 = vector.broadcast %cst_11 : bf16 to vector<10x1x128xbf16>
    %c0_12 = arith.constant 0 : index
    %c0_13 = arith.constant 0 : index
    %c0_14 = arith.constant 0 : index
    %19 = vector.load %arg10[%c0_12, %c0_13, %c0_14] : memref<10x32x128xbf16, #tpu.memory_space<vmem>>, vector<10x1x128xbf16>
    tpu.vector_store %arg10[%c0_12, %c0_13, %c0_14], %18 {strides = array<i32>} : memref<10x32x128xbf16, #tpu.memory_space<vmem>>, vector<10x1x128xbf16>,
    %c0_15 = arith.constant 0 : index
    %c17 = arith.constant 17 : index
    %c0_16 = arith.constant 0 : index
    %20 = vector.load %arg10[%c0_15, %c17, %c0_16] : memref<10x32x128xbf16, #tpu.memory_space<vmem>>, vector<10x1x128xbf16>
    tpu.vector_store %arg10[%c0_15, %c17, %c0_16], %18 {strides = array<i32>} : memref<10x32x128xbf16, #tpu.memory_space<vmem>>, vector<10x1x128xbf16>,
    %cst_17 = arith.constant 0.000000e+00 : bf16
    %21 = vector.broadcast %cst_17 : bf16 to vector<1x32x128xbf16>
    %c0_i32 = arith.constant 0 : i32
    %22 = arith.cmpi eq, %arg1, %c0_i32 : i32
    %23 = arith.extui %22 : i1 to i32
    %c0_i32_18 = arith.constant 0 : i32
    %24 = arith.cmpi ne, %23, %c0_i32_18 : i32
    scf.if %24 {
      %c0_65 = arith.constant 0 : index
      %c0_66 = arith.constant 0 : index
      %c0_67 = arith.constant 0 : index
      %127 = vector.load %arg10[%c0_65, %c0_66, %c0_67] : memref<10x32x128xbf16, #tpu.memory_space<vmem>>, vector<1x32x128xbf16>
      tpu.vector_store %arg10[%c0_65, %c0_66, %c0_67], %21 {strides = array<i32>} : memref<10x32x128xbf16, #tpu.memory_space<vmem>>, vector<1x32x128xbf16>,
    } else {
    }
    %c1_i32 = arith.constant 1 : i32
    %25 = arith.cmpi eq, %arg1, %c1_i32 : i32
    %26 = arith.extui %25 : i1 to i32
    %c0_i32_19 = arith.constant 0 : i32
    %27 = arith.cmpi ne, %26, %c0_i32_19 : i32
    scf.if %27 {
      %c9 = arith.constant 9 : index
      %c0_65 = arith.constant 0 : index
      %c0_66 = arith.constant 0 : index
      %127 = vector.load %arg10[%c9, %c0_65, %c0_66] : memref<10x32x128xbf16, #tpu.memory_space<vmem>>, vector<1x32x128xbf16>
      tpu.vector_store %arg10[%c9, %c0_65, %c0_66], %21 {strides = array<i32>} : memref<10x32x128xbf16, #tpu.memory_space<vmem>>, vector<1x32x128xbf16>,
    } else {
    }
    %c0_20 = arith.constant 0 : index
    %c0_21 = arith.constant 0 : index
    %28 = vector.load %arg5[%c0_20, %c0_21] : memref<9x128xf32, #tpu.memory_space<vmem>>, vector<9x128xf32>
    %cst_22 = arith.constant 0.000000e+00 : f32
    %29 = vector.broadcast %cst_22 : f32 to vector<8x16x128xf32>
    %c0_23 = arith.constant 0 : index
    %c0_24 = arith.constant 0 : index
    %c0_25 = arith.constant 0 : index
    %30 = vector.load %arg10[%c0_23, %c0_24, %c0_25] : memref<10x32x128xbf16, #tpu.memory_space<vmem>>, vector<8x16x128xbf16>
    %31 = vector.extract_strided_slice %28 {offsets = [0, 0], sizes = [1, 128], strides = [1, 1]} : vector<9x128xf32> to vector<1x128xf32>
    %32 = vector.shape_cast %31 : vector<1x128xf32> to vector<128xf32>
    %33 = vector.shape_cast %32 : vector<128xf32> to vector<1x1x128xf32>
    %34 = arith.extf %30 : vector<8x16x128xbf16> to vector<8x16x128xf32>
    %35 = vector.broadcast %33 : vector<1x1x128xf32> to vector<8x16x128xf32>
    %36 = arith.mulf %34, %35 : vector<8x16x128xf32>
    %37 = arith.addf %29, %36 : vector<8x16x128xf32>
    %c0_26 = arith.constant 0 : index
    %c1 = arith.constant 1 : index
    %c0_27 = arith.constant 0 : index
    %38 = vector.load %arg10[%c0_26, %c1, %c0_27] : memref<10x32x128xbf16, #tpu.memory_space<vmem>>, vector<8x16x128xbf16>
    %39 = vector.extract_strided_slice %28 {offsets = [1, 0], sizes = [1, 128], strides = [1, 1]} : vector<9x128xf32> to vector<1x128xf32>
    %40 = vector.shape_cast %39 : vector<1x128xf32> to vector<128xf32>
    %41 = vector.shape_cast %40 : vector<128xf32> to vector<1x1x128xf32>
    %42 = arith.extf %38 : vector<8x16x128xbf16> to vector<8x16x128xf32>
    %43 = vector.broadcast %41 : vector<1x1x128xf32> to vector<8x16x128xf32>
    %44 = arith.mulf %42, %43 : vector<8x16x128xf32>
    %45 = arith.addf %37, %44 : vector<8x16x128xf32>
    %c0_28 = arith.constant 0 : index
    %c2 = arith.constant 2 : index
    %c0_29 = arith.constant 0 : index
    %46 = vector.load %arg10[%c0_28, %c2, %c0_29] : memref<10x32x128xbf16, #tpu.memory_space<vmem>>, vector<8x16x128xbf16>
    %47 = vector.extract_strided_slice %28 {offsets = [2, 0], sizes = [1, 128], strides = [1, 1]} : vector<9x128xf32> to vector<1x128xf32>
    %48 = vector.shape_cast %47 : vector<1x128xf32> to vector<128xf32>
    %49 = vector.shape_cast %48 : vector<128xf32> to vector<1x1x128xf32>
    %50 = arith.extf %46 : vector<8x16x128xbf16> to vector<8x16x128xf32>
    %51 = vector.broadcast %49 : vector<1x1x128xf32> to vector<8x16x128xf32>
    %52 = arith.mulf %50, %51 : vector<8x16x128xf32>
    %53 = arith.addf %45, %52 : vector<8x16x128xf32>
    %c1_30 = arith.constant 1 : index
    %c0_31 = arith.constant 0 : index
    %c0_32 = arith.constant 0 : index
    %54 = vector.load %arg10[%c1_30, %c0_31, %c0_32] : memref<10x32x128xbf16, #tpu.memory_space<vmem>>, vector<8x16x128xbf16>
    %55 = vector.extract_strided_slice %28 {offsets = [3, 0], sizes = [1, 128], strides = [1, 1]} : vector<9x128xf32> to vector<1x128xf32>
    %56 = vector.shape_cast %55 : vector<1x128xf32> to vector<128xf32>
    %57 = vector.shape_cast %56 : vector<128xf32> to vector<1x1x128xf32>
    %58 = arith.extf %54 : vector<8x16x128xbf16> to vector<8x16x128xf32>
    %59 = vector.broadcast %57 : vector<1x1x128xf32> to vector<8x16x128xf32>
    %60 = arith.mulf %58, %59 : vector<8x16x128xf32>
    %61 = arith.addf %53, %60 : vector<8x16x128xf32>
    %c1_33 = arith.constant 1 : index
    %c1_34 = arith.constant 1 : index
    %c0_35 = arith.constant 0 : index
    %62 = vector.load %arg10[%c1_33, %c1_34, %c0_35] : memref<10x32x128xbf16, #tpu.memory_space<vmem>>, vector<8x16x128xbf16>
    %63 = vector.extract_strided_slice %28 {offsets = [4, 0], sizes = [1, 128], strides = [1, 1]} : vector<9x128xf32> to vector<1x128xf32>
    %64 = vector.shape_cast %63 : vector<1x128xf32> to vector<128xf32>
    %65 = vector.shape_cast %64 : vector<128xf32> to vector<1x1x128xf32>
    %66 = arith.extf %62 : vector<8x16x128xbf16> to vector<8x16x128xf32>
    %67 = vector.broadcast %65 : vector<1x1x128xf32> to vector<8x16x128xf32>
    %68 = arith.mulf %66, %67 : vector<8x16x128xf32>
    %69 = arith.addf %61, %68 : vector<8x16x128xf32>
    %c1_36 = arith.constant 1 : index
    %c2_37 = arith.constant 2 : index
    %c0_38 = arith.constant 0 : index
    %70 = vector.load %arg10[%c1_36, %c2_37, %c0_38] : memref<10x32x128xbf16, #tpu.memory_space<vmem>>, vector<8x16x128xbf16>
    %71 = vector.extract_strided_slice %28 {offsets = [5, 0], sizes = [1, 128], strides = [1, 1]} : vector<9x128xf32> to vector<1x128xf32>
    %72 = vector.shape_cast %71 : vector<1x128xf32> to vector<128xf32>
    %73 = vector.shape_cast %72 : vector<128xf32> to vector<1x1x128xf32>
    %74 = arith.extf %70 : vector<8x16x128xbf16> to vector<8x16x128xf32>
    %75 = vector.broadcast %73 : vector<1x1x128xf32> to vector<8x16x128xf32>
    %76 = arith.mulf %74, %75 : vector<8x16x128xf32>
    %77 = arith.addf %69, %76 : vector<8x16x128xf32>
    %c2_39 = arith.constant 2 : index
    %c0_40 = arith.constant 0 : index
    %c0_41 = arith.constant 0 : index
    %78 = vector.load %arg10[%c2_39, %c0_40, %c0_41] : memref<10x32x128xbf16, #tpu.memory_space<vmem>>, vector<8x16x128xbf16>
    %79 = vector.extract_strided_slice %28 {offsets = [6, 0], sizes = [1, 128], strides = [1, 1]} : vector<9x128xf32> to vector<1x128xf32>
    %80 = vector.shape_cast %79 : vector<1x128xf32> to vector<128xf32>
    %81 = vector.shape_cast %80 : vector<128xf32> to vector<1x1x128xf32>
    %82 = arith.extf %78 : vector<8x16x128xbf16> to vector<8x16x128xf32>
    %83 = vector.broadcast %81 : vector<1x1x128xf32> to vector<8x16x128xf32>
    %84 = arith.mulf %82, %83 : vector<8x16x128xf32>
    %85 = arith.addf %77, %84 : vector<8x16x128xf32>
    %c2_42 = arith.constant 2 : index
    %c1_43 = arith.constant 1 : index
    %c0_44 = arith.constant 0 : index
    %86 = vector.load %arg10[%c2_42, %c1_43, %c0_44] : memref<10x32x128xbf16, #tpu.memory_space<vmem>>, vector<8x16x128xbf16>
    %87 = vector.extract_strided_slice %28 {offsets = [7, 0], sizes = [1, 128], strides = [1, 1]} : vector<9x128xf32> to vector<1x128xf32>
    %88 = vector.shape_cast %87 : vector<1x128xf32> to vector<128xf32>
    %89 = vector.shape_cast %88 : vector<128xf32> to vector<1x1x128xf32>
    %90 = arith.extf %86 : vector<8x16x128xbf16> to vector<8x16x128xf32>
    %91 = vector.broadcast %89 : vector<1x1x128xf32> to vector<8x16x128xf32>
    %92 = arith.mulf %90, %91 : vector<8x16x128xf32>
    %93 = arith.addf %85, %92 : vector<8x16x128xf32>
    %c2_45 = arith.constant 2 : index
    %c2_46 = arith.constant 2 : index
    %c0_47 = arith.constant 0 : index
    %94 = vector.load %arg10[%c2_45, %c2_46, %c0_47] : memref<10x32x128xbf16, #tpu.memory_space<vmem>>, vector<8x16x128xbf16>
    %95 = vector.extract_strided_slice %28 {offsets = [8, 0], sizes = [1, 128], strides = [1, 1]} : vector<9x128xf32> to vector<1x128xf32>
    %96 = vector.shape_cast %95 : vector<1x128xf32> to vector<128xf32>
    %97 = vector.shape_cast %96 : vector<128xf32> to vector<1x1x128xf32>
    %98 = arith.extf %94 : vector<8x16x128xbf16> to vector<8x16x128xf32>
    %99 = vector.broadcast %97 : vector<1x1x128xf32> to vector<8x16x128xf32>
    %100 = arith.mulf %98, %99 : vector<8x16x128xf32>
    %101 = arith.addf %93, %100 : vector<8x16x128xf32>
    %c0_48 = arith.constant 0 : index
    %c0_49 = arith.constant 0 : index
    %102 = vector.load %arg6[%c0_48, %c0_49] : memref<1x128xf32, #tpu.memory_space<vmem>>, vector<1x128xf32>
    %103 = vector.shape_cast %102 : vector<1x128xf32> to vector<1x1x128xf32>
    %104 = vector.broadcast %103 : vector<1x1x128xf32> to vector<8x16x128xf32>
    %105 = arith.addf %101, %104 : vector<8x16x128xf32>
    %cst_50 = arith.constant 0.000000e+00 : f32
    %cst_51 = arith.constant 6.000000e+00 : f32
    %106 = vector.broadcast %cst_50 : f32 to vector<8x16x128xf32>
    %107 = arith.maximumf %106, %105 : vector<8x16x128xf32>
    %108 = vector.broadcast %cst_51 : f32 to vector<8x16x128xf32>
    %109 = arith.minimumf %108, %107 : vector<8x16x128xf32>
    %110 = vector.shape_cast %109 : vector<8x16x128xf32> to vector<128x128xf32>
    %111 = arith.truncf %110 : vector<128x128xf32> to vector<128x128xbf16>
    %c1_i32_52 = arith.constant 1 : i32
    %112 = arith.addi %1, %c1_i32_52 : i32
    %c0_53 = arith.constant 0 : index
    %113 = arith.index_cast %112 : i32 to index
    %c1_54 = arith.constant 1 : index
    %c0_55 = arith.constant 0 : index
    %114 = vector.load %arg2[%c0_53, %113, %c1_54, %c0_55] : memref<1x18x32x128xbf16, #tpu.memory_space<vmem>>, vector<1x8x16x128xbf16>
    %115 = vector.shape_cast %114 : vector<1x8x16x128xbf16> to vector<8x16x128xbf16>
    %116 = vector.shape_cast %115 : vector<8x16x128xbf16> to vector<128x128xbf16>
    %117 = tpu.concatenate %111, %116 in 1 : vector<128x128xbf16>, vector<128x128xbf16> -> vector<128x256xbf16>
    %c0_56 = arith.constant 0 : index
    %c0_57 = arith.constant 0 : index
    %118 = vector.load %arg7[%c0_56, %c0_57] : memref<256x128xbf16, #tpu.memory_space<vmem>>, vector<256x128xbf16>
    %cst_58 = arith.constant dense<0.000000e+00> : vector<128x128xf32>
    %119 = tpu.matmul %117, %118, %cst_58 {dimension_numbers = #tpu.dot_dimension_numbers<[1], [0], [0], [1], [0, 0, 1, 1], [], []>} : vector<128x256xbf16>, vector<256x128xbf16>, vector<128x128xf32> -> vector<128x128xf32>
    %c0_59 = arith.constant 0 : index
    %c0_60 = arith.constant 0 : index
    %120 = vector.load %arg8[%c0_59, %c0_60] : memref<1x128xf32, #tpu.memory_space<vmem>>, vector<1x128xf32>
    %121 = vector.broadcast %120 : vector<1x128xf32> to vector<128x128xf32>
    %122 = arith.addf %119, %121 : vector<128x128xf32>
    %123 = vector.shape_cast %122 : vector<128x128xf32> to vector<8x16x128xf32>
    %c0_61 = arith.constant 0 : index
    %c0_62 = arith.constant 0 : index
    %c0_63 = arith.constant 0 : index
    %c0_64 = arith.constant 0 : index
    %124 = vector.load %arg9[%c0_61, %c0_62, %c0_63, %c0_64] : memref<1x8x16x128xf32, #tpu.memory_space<vmem>>, vector<1x8x16x128xf32>
    %125 = vector.shape_cast %124 : vector<1x8x16x128xf32> to vector<8x16x128xf32>
    %126 = vector.shape_cast %123 : vector<8x16x128xf32> to vector<1x8x16x128xf32>
    tpu.vector_store %arg9[%c0_61, %c0_62, %c0_63, %c0_64], %126 {strides = array<i32>} : memref<1x8x16x128xf32, #tpu.memory_space<vmem>>, vector<1x8x16x128xf32>,
    return
  }
  func.func @transform_0(%arg0: i32, %arg1: i32) -> (i32, i32, i32, i32) {
    %c0_i32 = arith.constant 0 : i32
    %c0_i32_0 = arith.constant 0 : i32
    %c0_i32_1 = arith.constant 0 : i32
    %c0_i32_2 = arith.constant 0 : i32
    return %arg0, %c0_i32, %c0_i32_0, %c0_i32_1 : i32, i32, i32, i32
  }
  func.func @transform_1(%arg0: i32, %arg1: i32) -> (i32, i32) {
    %c0_i32 = arith.constant 0 : i32
    %c0_i32_0 = arith.constant 0 : i32
    %c0_i32_1 = arith.constant 0 : i32
    return %c0_i32, %c0_i32_0 : i32, i32
  }
  func.func @transform_2(%arg0: i32, %arg1: i32) -> (i32, i32) {
    %c0_i32 = arith.constant 0 : i32
    %c0_i32_0 = arith.constant 0 : i32
    %c0_i32_1 = arith.constant 0 : i32
    return %c0_i32, %c0_i32_0 : i32, i32
  }
  func.func @transform_3(%arg0: i32, %arg1: i32) -> (i32, i32) {
    %c0_i32 = arith.constant 0 : i32
    %c0_i32_0 = arith.constant 0 : i32
    %c0_i32_1 = arith.constant 0 : i32
    return %c0_i32, %c0_i32_0 : i32, i32
  }
  func.func @transform_4(%arg0: i32, %arg1: i32) -> (i32, i32) {
    %c0_i32 = arith.constant 0 : i32
    %c0_i32_0 = arith.constant 0 : i32
    %c0_i32_1 = arith.constant 0 : i32
    return %c0_i32, %c0_i32_0 : i32, i32
  }
  func.func @transform_5(%arg0: i32, %arg1: i32) -> (i32, i32) {
    %c0_i32 = arith.constant 0 : i32
    %c0_i32_0 = arith.constant 0 : i32
    %c0_i32_1 = arith.constant 0 : i32
    return %c0_i32, %c0_i32_0 : i32, i32
  }
  func.func @transform_6(%arg0: i32, %arg1: i32) -> (i32, i32) {
    %c0_i32 = arith.constant 0 : i32
    %c0_i32_0 = arith.constant 0 : i32
    %c0_i32_1 = arith.constant 0 : i32
    return %c0_i32, %c0_i32_0 : i32, i32
  }
  func.func @transform_7(%arg0: i32, %arg1: i32) -> (i32, i32, i32, i32) {
    %c0_i32 = arith.constant 0 : i32
    %c0_i32_0 = arith.constant 0 : i32
    %c0_i32_1 = arith.constant 0 : i32
    return %arg0, %arg1, %c0_i32, %c0_i32_0 : i32, i32, i32, i32
  }
}

</mosaic_0001>

<bundles_post_ra>
// kernel: tpu_custom_call.1
= control target key start
LH: loop header
LB: loop body
LE: loop exit
PB: predicated region body
PF: predicated region fallthrough
CT: control target
= control target key end

     0   :  { %s4661_s0 = inlined_call_operand.hbm [shape: bf16[2,18,32,128], index: 0, kind: input, shape index: {}]   ;;  %s4662_s1 = inlined_call_operand.hbm [shape: bf16[128,128], index: 1, kind: input, shape index: {}]   ;;  %s4663_s2 = inlined_call_operand.vmem [shape: f32[1,128], index: 2, kind: input, shape index: {}]   ;;  %s4664_s3 = inlined_call_operand.hbm [shape: f32[9,128], index: 3, kind: input, shape index: {}]   ;;  %s4665_s4 = inlined_call_operand.vmem [shape: f32[1,128], index: 4, kind: input, shape index: {}]   ;;  %s4666_s5 = inlined_call_operand.hbm [shape: bf16[256,128], index: 5, kind: input, shape index: {}]   ;;  %s4667_s6 = inlined_call_operand.vmem [shape: f32[1,128], index: 6, kind: input, shape index: {}]   ;;  %s4668_s7 = inlined_call_operand.hbm [shape: f32[2,16,16,128], index: 7, kind: output, shape index: {}]  }
   0x1   :  { %4680 = sst [smem:[#allocation24_spill]] %s4662_s1 }
   0x2   :  { %4681 = sst [smem:[#allocation25_spill]] %s4664_s3 }
   0x3   :  { %4682 = sst [smem:[#allocation26_spill]] %s4666_s5 }
   0x4   :  { %4683 = sst [smem:[#allocation27_spill]] %s4667_s6 }
   0x5   :  { %4684 = sst [smem:[#allocation28_spill]] %s4668_s7 }
   0x6   :  { %12 = vsyncpa [#allocation4], 0 }
   0x7   :  { %14 = vsyncpa [#allocation4 + $0x1], 0 }
   0x8   :  { %15 = vsyncpa [#allocation7], 0 }
   0x9   :  { %16 = vsyncpa [#allocation10], 0 }
   0xa   :  { %17 = vsyncpa [#allocation5], 0 }
   0xb   :  { %19 = vsyncpa [#allocation5 + $0x1], 0  ;;  %s3709_s24 = smov 0   ;;  %s3711_s25 = smov 0  }
   0xc   :  { %s3713_s26 = smov 0   ;;  %s3715_s27 = smov 0  }
   0xd   :  { %s3717_s28 = smov 0   ;;  %s3719_s29 = smov 0  }
   0xe   :  { %s3721_s30 = smov 0   ;;  %s3723_s8 = smov 0  }
   0xf   :  { %s3725_s9 = smov 0   ;;  %s3727_s10 = smov 0  }
  0x10   :  { %s3729_s11 = smov 0  }
  0x11 LB: > { %4685 = sst [smem:[#allocation16_spill]] %s3616_s24  ;;  %s2729_s12 = sadd.s32 4294967295, %s3656_s11   ;;  %s3656_s11 = sphi %s3729_s11, %s25_s11   ;;  %s3652_s10 = sphi %s3727_s10, %s4721_s10   ;;  %s3648_s9 = sphi %s3725_s9, %s4720_s9   ;;  %s3644_s8 = sphi %s3723_s8, %s4719_s8   ;;  %s3640_s30 = sphi %s3721_s30, %s4718_s30   ;;  %s3636_s29 = sphi %s3719_s29, %s4727_s29   ;;  %s3632_s28 = sphi %s3717_s28, %s4726_s28   ;;  %s3628_s27 = sphi %s3715_s27, %s4725_s27   ;;  %s3624_s26 = sphi %s3713_s26, %s4724_s26   ;;  %s3620_s25 = sphi %s3711_s25, %s4723_s25   ;;  %s3616_s24 = sphi %s3709_s24, %s4722_s24  }
  0x12   : > { %4686 = sst [smem:[#allocation17_spill]] %s3644_s8  ;;  %s2730_s13 = sadd.s32 4294967294, %s3656_s11  }
  0x13   : > { %4687 = sst [smem:[#allocation18_spill]] %s3648_s9  ;;  %p57_p0 = scmp.ne.s32.totalorder %s3632_s28, %s3628_s27 }
  0x14   : > { %4688 = sst [smem:[#allocation19_spill]] %s3652_s10  ;;  %p3765_p1 = scmp.eq.s32.totalorder %s2729_s12, 0 }
  0x15   : > { %p208_p2 = scmp.ne.s32.totalorder %s3624_s26, %s3620_s25  ;;  %p209_p3 = scmp.eq.s32.totalorder %s2729_s12, 3 }
  0x16   : > { %p3773_p4 = por %p3765_p1, %p57_p0  ;;  %p214_p5 = scmp.ne.s32.totalorder %s3620_s25, %s3616_s24 }
  0x17   : > { %p3779_p6 = por %p209_p3, %p208_p2  ;;  %p215_p7 = scmp.eq.s32.totalorder %s2730_s13, 3 }
  0x18   : > { %p2731_p8 = scmp.ge.s32.totalorder %s3656_s11, 1  ;;  %p222_p9 = scmp.lt.s32.totalorder %s3656_s11, 5 }
  0x19   : > { %s4691_s16 = scalar_select %p3779_p6, 1, 0 }
  0x1a   : > { %p3785_p10 = por %p215_p7, %p214_p5  ;;  %p3789_p11 = pnand %p2731_p8, %p222_p9 }
  0x1b   : > { %4692 = sst [smem:[#allocation20_spill]] %s4691_s16  ;;  %s3658_s22 = smov [#allocation6]  }
  0x1c   : > { %s4693_s17 = scalar_select %p3785_p10, 1, 0 }
  0x1d   : > { %s4696_s1 = sld [smem:[#allocation24_spill]]  ;;  %p3275_p12 = pneg %p3789_p11 }
  0x1e   : > { %4694 = sst [smem:[#allocation21_spill]] %s4693_s17  ;;  %s235_s23 = sshll.u32 %s3658_s22, 4  ;;  %s236_s23 = int_to_ptr.vmem [resolvable:$true] %s235_s23 }
  0x1f   : > { %p3800_p13 = pnand %p3275_p12, %p3765_p1  ;;  %s4698_s3 = sld [smem:[#allocation25_spill]] }
  0x20   : > { %s4673_s19 = smov 64   ;;  %s4674_s20 = smov 4  }
  0x21   : > { %s3661_s22 = smov [#allocation8]   ;;  %s4699_s5 = sld [smem:[#allocation26_spill]] }
  0x22   : > { %s3662_s24 = smov 128   ;;  %s3663_s16 = smov 8  }
  0x23   : > { %s233_s21 = sshll.u32 %s4696_s1, 4  ;;  %s252_s1 = sshll.u32 %s3661_s22, 4  ;;  %s234_s21 = int_to_ptr.hbm [resolvable:$true] %s233_s21  ;;  %s253_s1 = int_to_ptr.vmem [resolvable:$true] %s252_s1 }
  0x24   : > { %3278 = dma.hbm_to_vmem [thread:$0]  (!%p3800_p13), %s234_s21, 1024, %s236_s23, [#allocation7], %s4673_s19, %s4673_s19, %s4674_s20  }
  0x25   : > { %s250_s17 = sshll.u32 %s4698_s3, 4  ;;  %s3664_s21 = smov [#allocation9]   ;;  %s251_s17 = int_to_ptr.hbm [resolvable:$true] %s250_s17 }
  0x26   : > { %3281 = dma.hbm_to_vmem [thread:$0]  (!%p3800_p13), %s251_s17, 256, %s253_s1, [#allocation7], %s3662_s24, %s3662_s24, %s3663_s16  }
  0x27   : > { %s267_s3 = sshll.u32 %s4699_s5, 4  ;;  %s269_s23 = sshll.u32 %s3664_s21, 4  ;;  %s268_s3 = int_to_ptr.hbm [resolvable:$true] %s267_s3  ;;  %s270_s23 = int_to_ptr.vmem [resolvable:$true] %s269_s23 }
  0x28   : > { %3284 = dma.hbm_to_vmem [thread:$0]  (!%p3800_p13), %s268_s3, 2048, %s270_s23, [#allocation10], %s4673_s19, %s4673_s19, %s4674_s20  }
  0x29   : > { %s34_s22 = sadd.s32 1, %s3648_s9  ;;  %s37_s12 = sadd.s32 1, %s3652_s10 }
  0x2a   : > { %p35_p0 = scmp.ge.s32.totalorder %s34_s22, 2  ;;  %s44_s13 = sadd.s32 1, %s3636_s29 }
  0x2b   : > { %p51_p2 = scmp.ne.s32.totalorder %s3636_s29, %s3632_s28  ;;  %p52_p3 = scmp.eq.s32.totalorder %s3656_s11, 0 }
  0x2c   : > { %s4729_s22 = smov (%p35_p0, %s34_s22), 0  ;;  %s4731_s12 = smov (!%p35_p0, %s37_s12), %s3652_s10 }
  0x2d   : > { %4700 = sst [smem:[#allocation22_spill]] %s4729_s22  ;;  %p3831_p5 = por %p52_p3, %p51_p2 }
  0x2e   : > { %s194_s24 = ssub.s32 %s3648_s9, %s4729_s22  ;;  %p39_p7 = scmp.ge.s32.totalorder %s4731_s12, 2 }
  0x2f   : > { %s198_s3 = sadd.s32 1, %s3624_s26  ;;  %p3296_p8 = scmp.lt.s32.totalorder %s3656_s11, 4 }
  0x30   : > { %s286_s16 = sand.u32 1, %s3636_s29   ;;  %s4733_s12 = smov (%p39_p7, %s4731_s12), 0 }
  0x31   : > { %4702 = sst [smem:[#allocation23_spill]] %s4733_s12  ;;  %s3256_s17 = smul.u32 288, %s286_s16 }
  0x32   : > { %s41_s27 = ssub.s32 %s3652_s10, %s4733_s12  ;;  %s3257_s21 = smul.u32 288, %s3652_s10 }
  0x33   : > { %p42_p9 = scmp.eq.s32.totalorder %s41_s27, 0  ;;  %s195_s23 = sor.u32 %s194_s24, %s41_s27 }
  0x34   : > { %p196_p12 = scmp.eq.s32.totalorder %s195_s23, 0  ;;  %s295_s9 = scalar_lea.hbm %s4661_s0, %s3257_s21 }
  0x35   : > { %s3846_s19 = scalar_select %p42_p9, %s3636_s29, %s44_s13  }
  0x36   : > { %s3849_s20 = scalar_select %p196_p12, %s3624_s26, %s198_s3  }
  0x37   : > { %s290_s7 = scalar_lea.vmem [#allocation3], %s3256_s17  ;;  %s296_s6 = sshll.u32 %s295_s9, 4  ;;  %s297_s6 = int_to_ptr.hbm [resolvable:$true] %s296_s6 }
  0x38   : > { %s298_s8 = sshll.u32 %s290_s7, 4  ;;  %p3286_p13 = pnand %p3296_p8, %p3831_p5  ;;  %s299_s8 = int_to_ptr.vmem [resolvable:$true] %s298_s8 }
  0x39   : > { %s287_s12 = scalar_lea.sflag [#allocation4], %s286_s16  ;;  %s4703_s10 = smov 4  }
  0x3a   : > { %s4704_s24 = smov 64   ;;  %310 = sbr.rel (%p3789_p11) target bundleno = 779 (0x30b), region = 48 }
  0x3b   : > { %3288 = dma.hbm_to_vmem [thread:$0]  (!%p3286_p13), %s297_s6, 4608, %s299_s8, %s287_s12, %s4704_s24, %s4704_s24, %s4703_s10  }
  0x3c   : > { %s312_s5 = sand.u32 (!%p3789_p11), 1, %s3632_s28  }
  0x3d   : > { %s3864_s22 = smul.u32 (!%p3789_p11), 288, %s312_s5  ;;  %s313_s7 = scalar_lea.sflag (!%p3789_p11), [#allocation4], %s312_s5 }
  0x3f   : > { %s316_s9 = scalar_lea.vmem [#allocation3], %s3864_s22 }
  0x40   : > { %3599 = dma.done.wait (%p3773_p4), %s313_s7, 4608  }
  0x41   : > { %3601 = vsyncadd (%p3773_p4), %s313_s7, 4294962688 }
  0x42   : > { %3603 = dma.done.wait (%p3765_p1), [#allocation7], 1280  }
  0x43   : > { %3605 = vsyncadd (%p3765_p1), [#allocation7], 4294966016 }
  0x44   : > { %3607 = dma.done.wait (%p3765_p1), [#allocation10], 2048  }
  0x45   : > { %3609 = vsyncadd (%p3765_p1), [#allocation10], 4294965248  ;;  %s360_s6 = sand.u32 1, %s3620_s25   ;;  %v2985_v0 = vld [vmem:[#allocation6 + $0x38] sm:$0xff]  ;;  %v2984_v1 = vld [vmem:[#allocation6 + $0x30] sm:$0xff]  ;;  %s2957_s10 = sshll.u32 %s3640_s30, 7 }
  0x46   : > { %s3882_s8 = sshll.u32 %s360_s6, 7  ;;  %597 = vmatpush.bf16.msra.mxu0 %v2985_v0  ;;  %3241 = vmatpush.bf16.msra.mxu3 %v2985_v0  ;;  %v2983_v2 = vld [vmem:[#allocation6 + $0x28] sm:$0xff]  ;;  %v2982_v3 = vld [vmem:[#allocation6 + $0x20] sm:$0xff]  ;;  %v2981_v4 = vld [vmem:[#allocation6 + $0x18] sm:$0xff]  ;;  %s3887_s14 = scalar_lea.vmem %s316_s9, %s2957_s10 [#allocation3]  ;;  %vm866_vm0 = vcmask 1040384  }
  0x47   : > { %3240 = vmatpush.bf16.msra.mxu1 %v2985_v0  ;;  %v2980_v5 = vld [vmem:[#allocation6 + $0x10] sm:$0xff]  ;;  %v2979_v6 = vld [vmem:[#allocation6 + $0x8] sm:$0xff]  ;;  %v2978_v7 = vld [vmem:[#allocation6] sm:$0xff]  ;;  %vm867_vm1 = vsmask.f32 256  ;;  %s4005_s12 = scalar_lea.vmem [#allocation11], %s3882_s8 }
  0x48   : > { %v2958_v8 = vld [vmem:[%s3887_s14] sm:$0xff]  ;;  %v2969_v9 = vld [vmem:[%s3887_s14 + $0x58] sm:$0xff]  ;;  %v2959_v10 = vld [vmem:[%s3887_s14 + $0x8] sm:$0xff]  ;;  %vm899_vm3 = vsmask.f32 7938  ;;  %p2857_p1 = scmp.ne.s32.totalorder %s3640_s30, 0 }
  0x49   : > { %v2970_v11 = vld [vmem:[%s3887_s14 + $0x60] sm:$0xff]  ;;  %v2960_v12 = vld [vmem:[%s3887_s14 + $0x10] sm:$0xff]  ;;  %v2971_v13 = vld [vmem:[%s3887_s14 + $0x68] sm:$0xff] }
  0x4a   : > { %598 = vmatpush.bf16.msra.mxu0 %v2984_v1  ;;  %3243 = vmatpush.bf16.msra.mxu3 %v2984_v1  ;;  %v2961_v14 = vld [vmem:[%s3887_s14 + $0x18] sm:$0xff]  ;;  %v2972_v15 = vld [vmem:[%s3887_s14 + $0x70] sm:$0xff]  ;;  %v2962_v16 = vld [vmem:[%s3887_s14 + $0x20] sm:$0xff] }
  0x4b   : > { %3242 = vmatpush.bf16.msra.mxu1 %v2984_v1  ;;  %v2973_v17 = vld [vmem:[%s3887_s14 + $0x78] sm:$0xff]  ;;  %v2967_v18 = vld [vmem:[%s3887_s14 + $0x48] sm:$0xff]  ;;  %v2974_v20 = vld [vmem:[%s3887_s14 + $0x80] sm:$0xff] }
  0x4c   : > { %v2963_v19 = vld [vmem:[%s3887_s14 + $0x28] sm:$0xff]  ;;  %v2964_v21 = vld [vmem:[%s3887_s14 + $0x30] sm:$0xff]  ;;  %v2965_v24 = vld [vmem:[%s3887_s14 + $0x38] sm:$0xff] }
  0x4d   : > { %v2975_v22 = vld [vmem:[%s3887_s14 + $0x88] sm:$0xff]  ;;  %v2968_v23 = vld [vmem:[%s3887_s14 + $0x50] sm:$0xff]  ;;  %v2966_v26 = vld [vmem:[%s3887_s14 + $0x40] sm:$0xff] }
  0x4e   : > { %599 = vmatpush.bf16.msra.mxu0 %v2983_v2  ;;  %3245 = vmatpush.bf16.msra.mxu3 %v2983_v2  ;;  %v2976_v25 = vld [vmem:[%s3887_s14 + $0x90] sm:$0xff]  ;;  %v2977_v27 = vld [vmem:[%s3887_s14 + $0x98] sm:$0xff]  ;;  %v3912_v29 = vld [vmem:[%s4663_s2] ss:$0 sm:$0xff] }
  0x4f   : > { %3244 = vmatpush.bf16.msra.mxu1 %v2983_v2  ;;  %vm3920_vm2 = vmand %vm866_vm0, %vm867_vm1 }
  0x50   : > { %vm3929_vm4 = vmand %vm866_vm0, %vm899_vm3 }
  0x52   : > { %600 = vmatpush.bf16.msra.mxu0 %v2982_v3  ;;  %3247 = vmatpush.bf16.msra.mxu3 %v2982_v3 }
  0x53   : > { %3246 = vmatpush.bf16.msra.mxu1 %v2982_v3 }
  0x56   : > { %601 = vmatpush.bf16.msra.mxu0 %v2981_v4  ;;  %3249 = vmatpush.bf16.msra.mxu3 %v2981_v4 }
  0x57   : > { %3248 = vmatpush.bf16.msra.mxu1 %v2981_v4 }
  0x5a   : > { %602 = vmatpush.bf16.msra.mxu0 %v2980_v5  ;;  %3251 = vmatpush.bf16.msra.mxu3 %v2980_v5 }
  0x5b   : > { %3250 = vmatpush.bf16.msra.mxu1 %v2980_v5 }
  0x5e   : > { %603 = vmatpush.bf16.msra.mxu0 %v2979_v6  ;;  %3253 = vmatpush.bf16.msra.mxu3 %v2979_v6 }
  0x5f   : > { %3252 = vmatpush.bf16.msra.mxu1 %v2979_v6 }
  0x62   : > { %604 = vmatpush.bf16.msra.mxu0 %v2978_v7  ;;  %3255 = vmatpush.bf16.msra.mxu3 %v2978_v7 }
  0x63   : > { %3254 = vmatpush.bf16.msra.mxu1 %v2978_v7 }
  0x65   : > { %605 = vmatmul.bf16.vlgmr.msra.gmra.mxu0 %v2958_v8  ;;  %660 = vmatmul.bf16.vlgmr.msra.gmra.mxu3 %v2969_v9 }
  0x66   : > { %650 = vmatmul.bf16.vlgmr.msra.gmra.mxu1 %v2967_v18 }
  0x75   : > { %610 = vmatmul.bf16.gmra.mxu0 %v2959_v10  ;;  %665 = vmatmul.bf16.gmra.mxu3 %v2970_v11 }
  0x76   : > { %655 = vmatmul.bf16.gmra.mxu1 %v2968_v23 }
  0x85   : > { %615 = vmatmul.bf16.gmra.mxu0 %v2960_v12  ;;  %670 = vmatmul.bf16.gmra.mxu3 %v2971_v13 }
  0x95   : > { %620 = vmatmul.bf16.gmra.mxu0 %v2961_v14  ;;  %675 = vmatmul.bf16.gmra.mxu3 %v2972_v15 }
  0xa5   : > { %625 = vmatmul.bf16.gmra.mxu0 %v2962_v16  ;;  %680 = vmatmul.bf16.gmra.mxu3 %v2973_v17 }
  0xb5   : > { %630 = vmatmul.bf16.gmra.mxu0 %v2963_v19  ;;  %685 = vmatmul.bf16.gmra.mxu3 %v2974_v20 }
  0xc5   : > { %635 = vmatmul.bf16.gmra.mxu0 %v2964_v21  ;;  %690 = vmatmul.bf16.gmra.mxu3 %v2975_v22 }
  0xd5   : > { %640 = vmatmul.bf16.gmra.mxu0 %v2965_v24  ;;  %695 = vmatmul.bf16.gmra.mxu3 %v2976_v25 }
  0xe2   : > { %v606_v28 = vpop.f32.mrf.mxu0 }
  0xe3   : > { %v607_v30 = vadd.f32 %v3912_v29, %v606_v28 }
  0xe5   : > { %645 = vmatmul.bf16.gmra.mxu0 %v2966_v26  ;;  %700 = vmatmul.bf16.gmra.mxu3 %v2977_v27  ;;  %v706_v33 = vmax.f32 %v607_v30, 0.0 }
  0xe7   : > { %v746_v37 = vmin.f32 %v706_v33, 6.0 }
  0xe8   : > { %v661_v31 = vpop.f32.mrf.mxu3 }
  0xe9   : > { %v662_v35 = vadd.f32 %v3912_v29, %v661_v31 }
  0xea   : > { %v608_v32 = vpop.f32.mrf.mxu0 }
  0xeb   : > { %v609_v34 = vadd.f32 %v3912_v29, %v608_v32  ;;  %v728_v40 = vmax.f32 %v662_v35, 0.0 }
  0xed   : > { %v707_v36 = vmax.f32 %v609_v34, 0.0  ;;  %v768_v45 = vmin.f32 %v728_v40, 6.0 }
  0xef   : > { %v747_v38 = vmin.f32 %v707_v36, 6.0 }
  0xf0   : > { %v663_v39 = vpop.f32.mrf.mxu3 }
  0xf1   : > { %v3007_v41 = vpack.c.bf16 %v747_v38, %v746_v37  ;;  %v664_v42 = vadd.f32 %v3912_v29, %v663_v39 }
  0xf2   : > { %v611_v43 = vpop.f32.mrf.mxu0 }
  0xf3   : > { %3008 = vst [vmem:[#allocation2] sm:$0xff] %v3007_v41   ;;  %v729_v44 = vmax.f32 %v664_v42, 0.0  ;;  %v612_v48 = vadd.f32 %v3912_v29, %v611_v43 }
  0xf5   : > { %v769_v46 = vmin.f32 %v729_v44, 6.0  ;;  %v708_v54 = vmax.f32 %v612_v48, 0.0 }
  0xf7   : > { %v3062_v47 = vpack.c.bf16 %v769_v46, %v768_v45  ;;  %v748_v59 = vmin.f32 %v708_v54, 6.0 }
  0xf8   : > { %v666_v50 = vpop.f32.mrf.mxu3 }
  0xf9   : > { %3210 = vst [vmem:[#allocation2 + $0x58] sm:$0xff] %v3062_v47   ;;  %v667_v56 = vadd.f32 %v3912_v29, %v666_v50 }
  0xfa   : > { %v869_v51 = vld [vmem:[#allocation2] sm:$0x1]  ;;  %v613_v52 = vpop.f32.mrf.mxu0 }
  0xfb   : > { %v870_v53 = vsel %vm3920_vm2, 0, %v869_v51  ;;  %v614_v55 = vadd.f32 %v3912_v29, %v613_v52  ;;  %v730_v0 = vmax.f32 %v667_v56, 0.0 }
  0xfc   : > { %871 = vst [vmem:[#allocation2] sm:$0x1] %v870_v53 }
  0xfd   : > { %v709_v57 = vmax.f32 %v614_v55, 0.0  ;;  %v770_v5 = vmin.f32 %v730_v0, 6.0 }
  0xff   : > { %v749_v60 = vmin.f32 %v709_v57, 6.0 }
 0x100   : > { %v916_v61 = vld [vmem:[#allocation2 + $0x58] sm:$0x1]  ;;  %v668_v62 = vpop.f32.mrf.mxu3 }
 0x101   : > { %v917_v63 = vsel %vm3929_vm4, 0, %v916_v61  ;;  %v3012_v1 = vpack.c.bf16 %v749_v60, %v748_v59  ;;  %v669_v2 = vadd.f32 %v3912_v29, %v668_v62 }
 0x102   : > { %918 = vst [vmem:[#allocation2 + $0x58] sm:$0x1] %v917_v63  ;;  %v616_v3 = vpop.f32.mrf.mxu0 }
 0x103   : > { %3200 = vst [vmem:[#allocation2 + $0x8] sm:$0xff] %v3012_v1   ;;  %v731_v4 = vmax.f32 %v669_v2, 0.0  ;;  %v617_v8 = vadd.f32 %v3912_v29, %v616_v3 }
 0x105   : > { %v771_v6 = vmin.f32 %v731_v4, 6.0  ;;  %v710_v13 = vmax.f32 %v617_v8, 0.0  ;;  %v651_v4 = vpop.f32.mrf.mxu1 }
 0x107   : > { %v3067_v7 = vpack.c.bf16 %v771_v6, %v770_v5  ;;  %v750_v17 = vmin.f32 %v710_v13, 6.0 }
 0x108   : > { %v671_v9 = vpop.f32.mrf.mxu3 }
 0x109   : > { %3211 = vst [vmem:[#allocation2 + $0x60] sm:$0xff] %v3067_v7   ;;  %v672_v15 = vadd.f32 %v3912_v29, %v671_v9 }
 0x10a   : > { %v901_v10 = vld [vmem:[#allocation2 + $0x8] sm:$0x1]  ;;  %v618_v11 = vpop.f32.mrf.mxu0 }
 0x10b   : > { %v902_v12 = vsel %vm3929_vm4, 0, %v901_v10  ;;  %v619_v14 = vadd.f32 %v3912_v29, %v618_v11  ;;  %v732_v22 = vmax.f32 %v672_v15, 0.0 }
 0x10c   : > { %903 = vst [vmem:[#allocation2 + $0x8] sm:$0x1] %v902_v12 }
 0x10d   : > { %v711_v16 = vmax.f32 %v619_v14, 0.0  ;;  %v772_v27 = vmin.f32 %v732_v22, 6.0 }
 0x10f   : > { %v751_v18 = vmin.f32 %v711_v16, 6.0  ;;  %v653_v16 = vpop.f32.mrf.mxu1 }
 0x110   : > { %v887_v19 = vld [vmem:[#allocation2 + $0x60] sm:$0x1]  ;;  %v673_v20 = vpop.f32.mrf.mxu3 }
 0x111   : > { %v888_v21 = vsel %vm3920_vm2, 0, %v887_v19  ;;  %v3017_v23 = vpack.c.bf16 %v751_v18, %v750_v17  ;;  %v674_v24 = vadd.f32 %v3912_v29, %v673_v20  ;;  %v652_v17 = vadd.f32 %v3912_v29, %v651_v4 }
 0x112   : > { %889 = vst [vmem:[#allocation2 + $0x60] sm:$0x1] %v888_v21  ;;  %v621_v25 = vpop.f32.mrf.mxu0  ;;  %v654_v18 = vadd.f32 %v3912_v29, %v653_v16 }
 0x113   : > { %3201 = vst [vmem:[#allocation2 + $0x10] sm:$0xff] %v3017_v23   ;;  %v733_v26 = vmax.f32 %v674_v24, 0.0  ;;  %v622_v31 = vadd.f32 %v3912_v29, %v621_v25  ;;  %v724_v24 = vmax.f32 %v652_v17, 0.0 }
 0x114   : > { %v725_v25 = vmax.f32 %v654_v18, 0.0 }
 0x115   : > { %v773_v28 = vmin.f32 %v733_v26, 6.0  ;;  %v712_v36 = vmax.f32 %v622_v31, 0.0 }
 0x117   : > { %v3072_v30 = vpack.c.bf16 %v773_v28, %v772_v27  ;;  %v752_v40 = vmin.f32 %v712_v36, 6.0  ;;  %v764_v28 = vmin.f32 %v724_v24, 6.0  ;;  %v656_v36 = vpop.f32.mrf.mxu1 }
 0x118   : > { %v676_v32 = vpop.f32.mrf.mxu3 }
 0x119   : > { %3212 = vst [vmem:[#allocation2 + $0x68] sm:$0xff] %v3072_v30   ;;  %v677_v38 = vadd.f32 %v3912_v29, %v676_v32  ;;  %v765_v30 = vmin.f32 %v725_v25, 6.0 }
 0x11a   : > { %v872_v33 = vld [vmem:[#allocation2 + $0x10] sm:$0x1]  ;;  %v623_v34 = vpop.f32.mrf.mxu0 }
 0x11b   : > { %v873_v35 = vsel %vm3920_vm2, 0, %v872_v33  ;;  %v624_v37 = vadd.f32 %v3912_v29, %v623_v34  ;;  %v734_v45 = vmax.f32 %v677_v38, 0.0 }
 0x11c   : > { %874 = vst [vmem:[#allocation2 + $0x10] sm:$0x1] %v873_v35  ;;  %v3052_v35 = vpack.c.bf16 %v765_v30, %v764_v28 }
 0x11d   : > { %v713_v39 = vmax.f32 %v624_v37, 0.0  ;;  %v774_v51 = vmin.f32 %v734_v45, 6.0 }
 0x11e   : > { %3208 = vst [vmem:[#allocation2 + $0x48] sm:$0xff] %v3052_v35  }
 0x11f   : > { %v753_v41 = vmin.f32 %v713_v39, 6.0 }
 0x120   : > { %v919_v42 = vld [vmem:[#allocation2 + $0x68] sm:$0x1]  ;;  %v678_v43 = vpop.f32.mrf.mxu3 }
 0x121   : > { %v920_v44 = vsel %vm3929_vm4, 0, %v919_v42  ;;  %v3022_v46 = vpack.c.bf16 %v753_v41, %v752_v40  ;;  %v679_v47 = vadd.f32 %v3912_v29, %v678_v43 }
 0x122   : > { %921 = vst [vmem:[#allocation2 + $0x68] sm:$0x1] %v920_v44  ;;  %v626_v48 = vpop.f32.mrf.mxu0 }
 0x123   : > { %3202 = vst [vmem:[#allocation2 + $0x18] sm:$0xff] %v3022_v46   ;;  %v735_v50 = vmax.f32 %v679_v47, 0.0  ;;  %v627_v54 = vadd.f32 %v3912_v29, %v626_v48  ;;  %v658_v48 = vpop.f32.mrf.mxu1 }
 0x125   : > { %v775_v52 = vmin.f32 %v735_v50, 6.0  ;;  %v714_v60 = vmax.f32 %v627_v54, 0.0  ;;  %v657_v50 = vadd.f32 %v3912_v29, %v656_v36 }
 0x127   : > { %v3077_v53 = vpack.c.bf16 %v775_v52, %v774_v51  ;;  %v754_v0 = vmin.f32 %v714_v60, 6.0  ;;  %v659_v51 = vadd.f32 %v3912_v29, %v658_v48 }
 0x128   : > { %v681_v55 = vpop.f32.mrf.mxu3 }
 0x129   : > { %3213 = vst [vmem:[#allocation2 + $0x70] sm:$0xff] %v3077_v53   ;;  %v682_v62 = vadd.f32 %v3912_v29, %v681_v55 }
 0x12a   : > { %v904_v56 = vld [vmem:[#allocation2 + $0x18] sm:$0x1]  ;;  %v628_v57 = vpop.f32.mrf.mxu0 }
 0x12b   : > { %v905_v59 = vsel %vm3929_vm4, 0, %v904_v56  ;;  %v629_v61 = vadd.f32 %v3912_v29, %v628_v57  ;;  %v736_v6 = vmax.f32 %v682_v62, 0.0  ;;  %v913_v57 = vld [vmem:[#allocation2 + $0x48] sm:$0x1] }
 0x12c   : > { %906 = vst [vmem:[#allocation2 + $0x18] sm:$0x1] %v905_v59  ;;  %v726_v59 = vmax.f32 %v657_v50, 0.0  ;;  %v914_v60 = vsel %vm3929_vm4, 0, %v913_v57 }
 0x12d   : > { %v715_v63 = vmax.f32 %v629_v61, 0.0  ;;  %v776_v11 = vmin.f32 %v736_v6, 6.0  ;;  %v727_v61 = vmax.f32 %v659_v51, 0.0  ;;  %915 = vst [vmem:[#allocation2 + $0x48] sm:$0x1] %v914_v60 }
 0x12f   : > { %v755_v1 = vmin.f32 %v715_v63, 6.0 }
 0x130   : > { %v890_v2 = vld [vmem:[#allocation2 + $0x70] sm:$0x1]  ;;  %v683_v3 = vpop.f32.mrf.mxu3 }
 0x131   : > { %v891_v5 = vsel %vm3920_vm2, 0, %v890_v2  ;;  %v3027_v7 = vpack.c.bf16 %v755_v1, %v754_v0  ;;  %v684_v8 = vadd.f32 %v3912_v29, %v683_v3  ;;  %v766_v0 = vmin.f32 %v726_v59, 6.0 }
 0x132   : > { %892 = vst [vmem:[#allocation2 + $0x70] sm:$0x1] %v891_v5  ;;  %v631_v9 = vpop.f32.mrf.mxu0  ;;  %v767_v1 = vmin.f32 %v727_v61, 6.0 }
 0x133   : > { %3203 = vst [vmem:[#allocation2 + $0x20] sm:$0xff] %v3027_v7   ;;  %v737_v10 = vmax.f32 %v684_v8, 0.0  ;;  %v632_v14 = vadd.f32 %v3912_v29, %v631_v9 }
 0x134   : > { %v3057_v6 = vpack.c.bf16 %v767_v1, %v766_v0 }
 0x135   : > { %v777_v12 = vmin.f32 %v737_v10, 6.0  ;;  %v716_v22 = vmax.f32 %v632_v14, 0.0 }
 0x136   : > { %3209 = vst [vmem:[#allocation2 + $0x50] sm:$0xff] %v3057_v6  }
 0x137   : > { %v3082_v13 = vpack.c.bf16 %v777_v12, %v776_v11  ;;  %v756_v31 = vmin.f32 %v716_v22, 6.0 }
 0x138   : > { %v686_v15 = vpop.f32.mrf.mxu3 }
 0x139   : > { %3214 = vst [vmem:[#allocation2 + $0x78] sm:$0xff] %v3082_v13   ;;  %v687_v26 = vadd.f32 %v3912_v29, %v686_v15 }
 0x13a   : > { %v875_v19 = vld [vmem:[#allocation2 + $0x20] sm:$0x1]  ;;  %v633_v20 = vpop.f32.mrf.mxu0 }
 0x13b   : > { %v876_v21 = vsel %vm3920_vm2, 0, %v875_v19  ;;  %v634_v23 = vadd.f32 %v3912_v29, %v633_v20  ;;  %v738_v38 = vmax.f32 %v687_v26, 0.0 }
 0x13c   : > { %877 = vst [vmem:[#allocation2 + $0x20] sm:$0x1] %v876_v21 }
 0x13d   : > { %v717_v27 = vmax.f32 %v634_v23, 0.0  ;;  %v778_v43 = vmin.f32 %v738_v38, 6.0  ;;  %v884_v23 = vld [vmem:[#allocation2 + $0x50] sm:$0x1] }
 0x13e   : > { %v885_v24 = vsel %vm3920_vm2, 0, %v884_v23 }
 0x13f   : > { %v757_v32 = vmin.f32 %v717_v27, 6.0  ;;  %886 = vst [vmem:[#allocation2 + $0x50] sm:$0x1] %v885_v24 }
 0x140   : > { %v922_v33 = vld [vmem:[#allocation2 + $0x78] sm:$0x1]  ;;  %v688_v34 = vpop.f32.mrf.mxu3 }
 0x141   : > { %v923_v37 = vsel %vm3929_vm4, 0, %v922_v33  ;;  %v3032_v39 = vpack.c.bf16 %v757_v32, %v756_v31  ;;  %v689_v40 = vadd.f32 %v3912_v29, %v688_v34 }
 0x142   : > { %924 = vst [vmem:[#allocation2 + $0x78] sm:$0x1] %v923_v37  ;;  %v636_v41 = vpop.f32.mrf.mxu0 }
 0x143   : > { %3204 = vst [vmem:[#allocation2 + $0x28] sm:$0xff] %v3032_v39   ;;  %v739_v42 = vmax.f32 %v689_v40, 0.0  ;;  %v637_v46 = vadd.f32 %v3912_v29, %v636_v41 }
 0x145   : > { %v779_v44 = vmin.f32 %v739_v42, 6.0  ;;  %v718_v55 = vmax.f32 %v637_v46, 0.0 }
 0x147   : > { %v3087_v45 = vpack.c.bf16 %v779_v44, %v778_v43  ;;  %v758_v2 = vmin.f32 %v718_v55, 6.0 }
 0x148   : > { %v691_v47 = vpop.f32.mrf.mxu3 }
 0x149   : > { %3215 = vst [vmem:[#allocation2 + $0x80] sm:$0xff] %v3087_v45   ;;  %v692_v62 = vadd.f32 %v3912_v29, %v691_v47 }
 0x14a   : > { %v907_v52 = vld [vmem:[#allocation2 + $0x28] sm:$0x1]  ;;  %v638_v53 = vpop.f32.mrf.mxu0 }
 0x14b   : > { %v908_v54 = vsel %vm3929_vm4, 0, %v907_v52  ;;  %v639_v56 = vadd.f32 %v3912_v29, %v638_v53  ;;  %v740_v8 = vmax.f32 %v692_v62, 0.0 }
 0x14c   : > { %909 = vst [vmem:[#allocation2 + $0x28] sm:$0x1] %v908_v54 }
 0x14d   : > { %v719_v63 = vmax.f32 %v639_v56, 0.0  ;;  %v780_v13 = vmin.f32 %v740_v8, 6.0 }
 0x14f   : > { %v759_v3 = vmin.f32 %v719_v63, 6.0 }
 0x150   : > { %v893_v4 = vld [vmem:[#allocation2 + $0x80] sm:$0x1]  ;;  %v693_v5 = vpop.f32.mrf.mxu3 }
 0x151   : > { %v894_v7 = vsel %vm3920_vm2, 0, %v893_v4  ;;  %v3037_v9 = vpack.c.bf16 %v759_v3, %v758_v2  ;;  %v694_v10 = vadd.f32 %v3912_v29, %v693_v5 }
 0x152   : > { %895 = vst [vmem:[#allocation2 + $0x80] sm:$0x1] %v894_v7  ;;  %v641_v11 = vpop.f32.mrf.mxu0 }
 0x153   : > { %3205 = vst [vmem:[#allocation2 + $0x30] sm:$0xff] %v3037_v9   ;;  %v741_v12 = vmax.f32 %v694_v10, 0.0  ;;  %v642_v16 = vadd.f32 %v3912_v29, %v641_v11 }
 0x155   : > { %v781_v14 = vmin.f32 %v741_v12, 6.0  ;;  %v720_v21 = vmax.f32 %v642_v16, 0.0 }
 0x157   : > { %v3092_v15 = vpack.c.bf16 %v781_v14, %v780_v13  ;;  %v760_v27 = vmin.f32 %v720_v21, 6.0 }
 0x158   : > { %v696_v17 = vpop.f32.mrf.mxu3 }
 0x159   : > { %3216 = vst [vmem:[#allocation2 + $0x88] sm:$0xff] %v3092_v15   ;;  %v697_v25 = vadd.f32 %v3912_v29, %v696_v17 }
 0x15a   : > { %v878_v18 = vld [vmem:[#allocation2 + $0x30] sm:$0x1]  ;;  %v643_v19 = vpop.f32.mrf.mxu0 }
 0x15b   : > { %v879_v20 = vsel %vm3920_vm2, 0, %v878_v18  ;;  %v644_v22 = vadd.f32 %v3912_v29, %v643_v19  ;;  %v742_v33 = vmax.f32 %v697_v25, 0.0 }
 0x15c   : > { %880 = vst [vmem:[#allocation2 + $0x30] sm:$0x1] %v879_v20 }
 0x15d   : > { %v721_v26 = vmax.f32 %v644_v22, 0.0  ;;  %v782_v38 = vmin.f32 %v742_v33, 6.0 }
 0x15f   : > { %v761_v28 = vmin.f32 %v721_v26, 6.0 }
 0x160   : > { %v925_v30 = vld [vmem:[#allocation2 + $0x88] sm:$0x1]  ;;  %v698_v31 = vpop.f32.mrf.mxu3 }
 0x161   : > { %v926_v32 = vsel %vm3929_vm4, 0, %v925_v30  ;;  %v3042_v34 = vpack.c.bf16 %v761_v28, %v760_v27  ;;  %v699_v35 = vadd.f32 %v3912_v29, %v698_v31 }
 0x162   : > { %927 = vst [vmem:[#allocation2 + $0x88] sm:$0x1] %v926_v32  ;;  %v646_v36 = vpop.f32.mrf.mxu0 }
 0x163   : > { %3206 = vst [vmem:[#allocation2 + $0x38] sm:$0xff] %v3042_v34   ;;  %v743_v37 = vmax.f32 %v699_v35, 0.0  ;;  %v647_v41 = vadd.f32 %v3912_v29, %v646_v36 }
 0x165   : > { %v783_v39 = vmin.f32 %v743_v37, 6.0  ;;  %v722_v46 = vmax.f32 %v647_v41, 0.0 }
 0x167   : > { %v3097_v40 = vpack.c.bf16 %v783_v39, %v782_v38  ;;  %v762_v51 = vmin.f32 %v722_v46, 6.0 }
 0x168   : > { %v701_v42 = vpop.f32.mrf.mxu3 }
 0x169   : > { %3217 = vst [vmem:[#allocation2 + $0x90] sm:$0xff] %v3097_v40   ;;  %v702_v48 = vadd.f32 %v3912_v29, %v701_v42 }
 0x16a   : > { %v910_v43 = vld [vmem:[#allocation2 + $0x38] sm:$0x1]  ;;  %v648_v44 = vpop.f32.mrf.mxu0 }
 0x16b   : > { %v911_v45 = vsel %vm3929_vm4, 0, %v910_v43  ;;  %v649_v47 = vadd.f32 %v3912_v29, %v648_v44  ;;  %v744_v56 = vmax.f32 %v702_v48, 0.0 }
 0x16c   : > { %912 = vst [vmem:[#allocation2 + $0x38] sm:$0x1] %v911_v45 }
 0x16d   : > { %v723_v50 = vmax.f32 %v649_v47, 0.0  ;;  %v784_v61 = vmin.f32 %v744_v56, 6.0 }
 0x16f   : > { %v763_v52 = vmin.f32 %v723_v50, 6.0 }
 0x170   : > { %v896_v53 = vld [vmem:[#allocation2 + $0x90] sm:$0x1]  ;;  %v703_v54 = vpop.f32.mrf.mxu3 }
 0x171   : > { %v897_v55 = vsel %vm3920_vm2, 0, %v896_v53  ;;  %v3047_v57 = vpack.c.bf16 %v763_v52, %v762_v51  ;;  %v704_v59 = vadd.f32 %v3912_v29, %v703_v54 }
 0x172   : > { %898 = vst [vmem:[#allocation2 + $0x90] sm:$0x1] %v897_v55 }
 0x173   : > { %3207 = vst [vmem:[#allocation2 + $0x40] sm:$0xff] %v3047_v57   ;;  %v745_v60 = vmax.f32 %v704_v59, 0.0 }
 0x175   : > { %v785_v62 = vmin.f32 %v745_v60, 6.0 }
 0x177   : > { %v3102_v63 = vpack.c.bf16 %v785_v62, %v784_v61 }
 0x179   : > { %3218 = vst [vmem:[#allocation2 + $0x98] sm:$0xff] %v3102_v63  }
 0x17a   : > { %v881_v0 = vld [vmem:[#allocation2 + $0x40] sm:$0x1] }
 0x17b   : > { %v882_v1 = vsel %vm3920_vm2, 0, %v881_v0 }
 0x17c   : > { %883 = vst [vmem:[#allocation2 + $0x40] sm:$0x1] %v882_v1 }
 0x17e   : > { %934 = sbr.rel (%p2857_p1) target bundleno = 391 (0x187), region = 68 }
 0x180   : > { %v928_v2 = vld [vmem:[#allocation2 + $0x98] sm:$0x1] }
 0x181   : > { %v929_v3 = vsel %vm3929_vm4, 0, %v928_v2 }
 0x182   : > { %930 = vst [vmem:[#allocation2 + $0x98] sm:$0x1] %v929_v3 }
 0x183   : > { %v3665_v29 = vmov 0  }
 0x184   : > { %935 = vst [vmem:[#allocation2] sm:$0xf] %v3665_v29 }
 0x185   : > { %936 = vst [vmem:[#allocation2 + $0x4] sm:$0xf] %v3665_v29 }
 0x186   : > { %937 = vst [vmem:[#allocation2 + $0x8] sm:$0xf] %v3665_v29 }
 0x187 PF: > { %p2858_p4 = scmp.ne.s32.totalorder %s3640_s30, 1 }
 0x189   : > { %942 = sbr.rel (%p2858_p4) target bundleno = 402 (0x192), region = 72 }
 0x18e   : > { %v3666_v49 = vmov 0  }
 0x18f   : > { %944 = vst [vmem:[#allocation2 + $0x90] sm:$0xf] %v3666_v49 }
 0x190   : > { %945 = vst [vmem:[#allocation2 + $0x94] sm:$0xf] %v3666_v49 }
 0x191   : > { %946 = vst [vmem:[#allocation2 + $0x98] sm:$0xf] %v3666_v49 }
 0x192 PF: > { %v3002_v58 = vld [vmem:[#allocation9 + $0x78] sm:$0xff]  ;;  %v3001_v5 = vld [vmem:[#allocation9 + $0x70] sm:$0xff]  ;;  %v3000_v7 = vld [vmem:[#allocation9 + $0x68] sm:$0xff]  ;;  %vm2067_vm5 = vsmask.f32 3328  ;;  %vm1080_vm7 = vcmask 1046528  }
 0x193   : > { %v2994_v4 = vld [vmem:[#allocation9 + $0x38] sm:$0xff]  ;;  %2523 = vmatpush.bf16.msra.mxu2 %v3002_v58  ;;  %v2993_v6 = vld [vmem:[#allocation9 + $0x30] sm:$0xff]  ;;  %v2992_v8 = vld [vmem:[#allocation9 + $0x28] sm:$0xff]  ;;  %vm2068_vm6 = vsmask.f32 7440  ;;  %vm1218_vm8 = vcmask 1045504  }
 0x194   : > { %2474 = vmatpush.bf16.msrb.mxu1 %v2994_v4  ;;  %v2861_v9 = vld [vmem:[%s3887_s14 + $0x10] sm:$0xf]  ;;  %v2862_v10 = vld [vmem:[%s3887_s14 + $0x14] sm:$0xf]  ;;  %v2863_v11 = vld [vmem:[%s3887_s14 + $0x18] sm:$0x1] }
 0x195   : > { %v2071_v12 = vshrl.u32 %v2861_v9, 16  ;;  %v2074_v13 = vshll.u32 %v2861_v9, 16  ;;  %v2080_v14 = vshll.u32 %v2862_v10, 16  ;;  %v2084_v15 = vshrl.u32 %v2862_v10, 16  ;;  %v4012_v17 = vld [vmem:[#allocation8] sm:$0xff]  ;;  %v2999_v30 = vld [vmem:[#allocation9 + $0x60] sm:$0xff]  ;;  %vm4022_vm9 = vmor %vm2067_vm5, %vm2068_vm6 }
 0x196   : > { %v2090_v16 = vshll.u32 %v2863_v11, 16  ;;  %v3105_v18 = vld [vmem:[#allocation2] sm:$0xff]   ;;  %v1015_v23 = vld [vmem:[#allocation2 + $0x8] sm:$0x1]  ;;  %v4015_v27 = vperm.slane %v4012_v17, 0  ;;  %v2991_v31 = vld [vmem:[#allocation9 + $0x20] sm:$0xff] }
 0x197   : > { %2524 = vmatpush.bf16.msra.mxu2 %v3001_v5  ;;  %v2073_v19 = vrot.slane %v2071_v12, 4  ;;  %v2076_v20 = vrot.slane %v2074_v13, 5  ;;  %v2082_v21 = vrot.slane %v2080_v14, 5  ;;  %v2086_v22 = vrot.slane %v2084_v15, 4  ;;  %v1153_v28 = vld [vmem:[#allocation2] sm:$0xe] }
 0x198   : > { %2475 = vmatpush.bf16.msrb.mxu1 %v2993_v6  ;;  %v2092_v24 = vrot.slane %v2090_v16, 5  ;;  %v3106_v25 = vunpack.c.l.bf16 %v3105_v18  ;;  %v3107_v26 = vunpack.c.h.bf16 %v3105_v18  ;;  %v1023_v34 = vunpack.c.l.bf16 %v1015_v23  ;;  %v3137_v50 = vld [vmem:[#allocation2 + $0x10] sm:$0xff]   ;;  %v2998_v51 = vld [vmem:[#allocation9 + $0x58] sm:$0xff]  ;;  %v1357_v2 = vld [vmem:[#allocation2 + $0x18] sm:$0x1]  ;;  %s4711_s21 = sld [smem:[#allocation27_spill]] }
 0x199   : > { %v2077_v32 = vor.u32 %v2076_v20, %v2073_v19  ;;  %v2087_v33 = vor.u32 %v2086_v22, %v2082_v21  ;;  %v4018_v35 = vperm.slane %v4012_v17, 1  ;;  %v1161_v39 = vunpack.c.l.bf16 %v1153_v28  ;;  %v2990_v52 = vld [vmem:[#allocation9 + $0x18] sm:$0xff]  ;;  %v1494_v3 = vld [vmem:[#allocation2 + $0x10] sm:$0xe]  ;;  %v2997_v5 = vld [vmem:[#allocation9 + $0x50] sm:$0xff]  ;;  %s4712_s23 = sld [smem:[#allocation17_spill]] }
 0x19a   : > { %v983_v37 = vmul.f32 %v3106_v25, %v4015_v27  ;;  %v984_v38 = vmul.f32 %v3107_v26, %v4015_v27  ;;  %v4029_v40 = vperm.slane %v4012_v17, 2  ;;  %v4046_v1 = vunpack.c.l.bf16 %v3137_v50  ;;  %v2989_v6 = vld [vmem:[#allocation9 + $0x10] sm:$0xff]  ;;  %v2988_v28 = vld [vmem:[#allocation9 + $0x8] sm:$0xff]  ;;  %s3003_s24 = sshll.u32 %s3640_s30, 4  ;;  %s4713_s10 = sld [smem:[#allocation28_spill]] }
 0x19b   : > { %2525 = vmatpush.bf16.msra.mxu2 %v3000_v7  ;;  %v2078_v41 = vrot.slane %v2077_v32, 4  ;;  %v2088_v42 = vrot.slane %v2087_v33, 4  ;;  %v1032_v43 = vmul.f32 %v3106_v25, %v4018_v35  ;;  %v1033_v44 = vmul.f32 %v3107_v26, %v4018_v35  ;;  %v3169_v11 = vld [vmem:[#allocation2 + $0x20] sm:$0xff]   ;;  %v1697_v25 = vld [vmem:[#allocation2 + $0x28] sm:$0x1]  ;;  %s2604_s13 = sshll.u32 %s4005_s12, 4  ;;  %s2605_s13 = int_to_ptr.vmem [resolvable:$true] %s2604_s13 }
 0x19c   : > { %2476 = vmatpush.bf16.msrb.mxu1 %v2992_v8  ;;  %v1034_v45 = vmul.f32 %v4018_v35, %v1023_v34  ;;  %v1170_v46 = vmul.f32 %v4029_v40, %v1161_v39  ;;  %v1171_v47 = vmul.f32 %v3107_v26, %v4029_v40  ;;  %v1172_v48 = vmul.f32 %v4029_v40, %v1023_v34  ;;  %v2996_v26 = vld [vmem:[#allocation9 + $0x48] sm:$0xff]  ;;  %s2589_s30 = scalar_lea.sflag [#allocation5], %s360_s6 }
 0x19d   : > { %v2083_v53 = vsel %vm4022_vm9, %v2078_v41, %v2082_v21  ;;  %v2093_v54 = vsel %vm4022_vm9, %v2088_v42, %v2092_v24  ;;  %v1081_v55 = vrot.slane %v1032_v43, 1  ;;  %v1082_v56 = vrot.slane %v1033_v44, 1 }
 0x19e   : > { %v4041_v57 = vunpack.c.l.b16 %v2083_v53  ;;  %v4043_v59 = vunpack.c.l.b16 %v2093_v54  ;;  %v1084_v60 = vrot.slane %v1034_v45, 1  ;;  %v1219_v61 = vrot.slane %v1170_v46, 2  ;;  %v2987_v53 = vld [vmem:[#allocation9] sm:$0xff] }
 0x19f   : > { %2526 = vmatpush.bf16.msra.mxu2 %v2999_v30  ;;  %v1083_v62 = vsel %vm1080_vm7, %v1081_v55, %v1082_v56  ;;  %v1220_v63 = vrot.slane %v1171_v47, 2  ;;  %v1222_v0 = vrot.slane %v1172_v48, 2  ;;  %v4051_v4 = vunpack.c.h.bf16 %v3137_v50  ;;  %v1834_v50 = vld [vmem:[#allocation2 + $0x20] sm:$0xe]  ;;  %s2952_s5 = sshll.u32 %s4712_s23, 5 }
 0x1a0   : > { %2477 = vmatpush.bf16.msrb.mxu1 %v2991_v31  ;;  %v2326_v29 = vpack.c.b16 %v4043_v59, %v4041_v57  ;;  %v1085_v49 = vsel %vm1080_vm7, %v1082_v56, %v1084_v60  ;;  %v1137_v58 = vadd.f32 %v1083_v62, %v983_v37  ;;  %v4056_v10 = vperm.slane %v4012_v17, 3  ;;  %s2601_s22 = sadd.s32 %s3003_s24, %s2952_s5 }
 0x1a1   : > { %v1138_v7 = vadd.f32 %v1085_v49, %v984_v38  ;;  %v1221_v8 = vsel %vm1218_vm8, %v1219_v61, %v1220_v63  ;;  %v1223_v9 = vsel %vm1218_vm8, %v1220_v63, %v1222_v0  ;;  %v1365_v13 = vunpack.c.l.bf16 %v1357_v2  ;;  %s2953_s7 = sshll.u32 %s2601_s22, 3 }
 0x1a2   : > { %v1275_v12 = vadd.f32 %v1221_v8, %v1137_v58  ;;  %v4059_v14 = vperm.slane %v4012_v17, 4  ;;  %v1502_v15 = vunpack.c.l.bf16 %v1494_v3  ;;  %v1325_v18 = vmul.f32 %v4046_v1, %v4056_v10  ;;  %v2864_v58 = vld [vmem:[%s3887_s14 + $0x20] sm:$0xf]  ;;  %s2603_s15 = scalar_lea.hbm %s4713_s10, %s2953_s7 }
 0x1a3   : > { %2527 = vmatpush.bf16.msra.mxu2 %v2998_v51  ;;  %v1276_v16 = vadd.f32 %v1223_v9, %v1138_v7  ;;  %v1326_v19 = vmul.f32 %v4051_v4, %v4056_v10  ;;  %v4066_v20 = vperm.slane %v4012_v17, 5  ;;  %v4073_v24 = vunpack.c.l.bf16 %v3169_v11  ;;  %v4089_v51 = vld [vmem:[#allocation8 + $0x8] ss:$0 sm:$0xff]  ;;  %s2606_s1 = sshll.u32 %s2603_s15, 4  ;;  %s2607_s1 = int_to_ptr.hbm [resolvable:$true] %s2606_s1 }
 0x1a4   : > { %2478 = vmatpush.bf16.msrb.mxu1 %v2990_v52  ;;  %v1374_v21 = vmul.f32 %v4046_v1, %v4059_v14  ;;  %v1375_v22 = vmul.f32 %v4051_v4, %v4059_v14  ;;  %v1376_v23 = vmul.f32 %v4059_v14, %v1365_v13  ;;  %v1341_v30 = vadd.f32 %v1325_v18, %v1275_v12  ;;  %v2995_v52 = vld [vmem:[#allocation9 + $0x40] sm:$0xff]  ;;  %s3540_s3 = sshra.s32 %s2607_s1, 4  ;;  %s3541_s3 = int_to_ptr.hbm [resolvable:$true] %s3540_s3 }
 0x1a5   : > { %v1342_v31 = vadd.f32 %v1326_v19, %v1276_v16  ;;  %v1511_v32 = vmul.f32 %v4066_v20, %v1502_v15  ;;  %v4076_v33 = vunpack.c.h.bf16 %v3169_v11  ;;  %v1512_v39 = vmul.f32 %v4051_v4, %v4066_v20  ;;  %v2865_v15 = vld [vmem:[%s3887_s14 + $0x24] sm:$0xf]  ;;  %s3542_s16 = scalar_lea.hbm %s3541_s3, 128 }
 0x1a6   : > { %v1422_v34 = vrot.slane %v1374_v21, 1  ;;  %v1423_v37 = vrot.slane %v1375_v22, 1  ;;  %v1425_v38 = vrot.slane %v1376_v23, 1  ;;  %v1513_v41 = vmul.f32 %v4066_v20, %v1365_v13  ;;  %v2866_v21 = vld [vmem:[%s3887_s14 + $0x28] sm:$0x1]  ;;  %p3543_p11 = scmp.ne.s32.totalorder %s3541_s3, %s3542_s16 }
 0x1a7   : > { %2528 = vmatpush.bf16.msra.mxu2 %v2997_v5  ;;  %v1559_v42 = vrot.slane %v1511_v32, 2  ;;  %v4082_v43 = vperm.slane %v4012_v17, 6  ;;  %v1705_v44 = vunpack.c.l.bf16 %v1697_v25  ;;  %v1560_v47 = vrot.slane %v1512_v39, 2 }
 0x1a8   : > { %2479 = vmatpush.bf16.msrb.mxu1 %v2989_v6  ;;  %v1424_v45 = vsel %vm1080_vm7, %v1422_v34, %v1423_v37  ;;  %v1426_v46 = vsel %vm1080_vm7, %v1423_v37, %v1425_v38  ;;  %v4087_v48 = vperm.slane %v4012_v17, 7  ;;  %v1562_v56 = vrot.slane %v1513_v41, 2  ;;  %p3544_p0 = pnand %p3543_p11, %p3779_p6 }
 0x1a9   : > { %v1478_v54 = vadd.f32 %v1424_v45, %v1341_v30  ;;  %v1479_v55 = vadd.f32 %v1426_v46, %v1342_v31  ;;  %v1665_v60 = vmul.f32 %v4073_v24, %v4082_v43  ;;  %v1561_v61 = vsel %vm1218_vm8, %v1559_v42, %v1560_v47  ;;  %v4117_v31 = vld [vmem:[%s4665_s4] ss:$0 sm:$0xff] }
 0x1aa   : > { %v1666_v17 = vmul.f32 %v4076_v33, %v4082_v43  ;;  %v1714_v62 = vmul.f32 %v4073_v24, %v4087_v48  ;;  %v1715_v63 = vmul.f32 %v4076_v33, %v4087_v48  ;;  %v1563_v0 = vsel %vm1218_vm8, %v1560_v47, %v1562_v56  ;;  %p3545_p2 = pneg %p3544_p0 }
 0x1ab   : > { %2529 = vmatpush.bf16.msra.mxu2 %v2996_v26  ;;  %v1615_v2 = vadd.f32 %v1561_v61, %v1478_v54  ;;  %v1716_v3 = vmul.f32 %v4087_v48, %v1705_v44  ;;  %v1842_v49 = vunpack.c.l.bf16 %v1834_v50  ;;  %v1616_v5 = vadd.f32 %v1563_v0, %v1479_v55 }
 0x1ac   : > { %2480 = vmatpush.bf16.msrb.mxu1 %v2988_v28  ;;  %v1762_v6 = vrot.slane %v1714_v62, 1  ;;  %v1763_v7 = vrot.slane %v1715_v63, 1  ;;  %v1852_v8 = vmul.f32 %v4089_v51, %v4076_v33  ;;  %v1853_v13 = vmul.f32 %v4089_v51, %v1705_v44  ;;  %v1016_v44 = vld [vmem:[#allocation2 + $0x18] sm:$0x1] }
 0x1ad   : > { %v1681_v9 = vadd.f32 %v1665_v60, %v1615_v2  ;;  %v1765_v11 = vrot.slane %v1716_v3, 1  ;;  %v1851_v12 = vmul.f32 %v4089_v51, %v1842_v49  ;;  %v1682_v16 = vadd.f32 %v1666_v17, %v1616_v5 }
 0x1ae   : > { %v1764_v18 = vsel %vm1080_vm7, %v1762_v6, %v1763_v7  ;;  %v1900_v19 = vrot.slane %v1852_v8, 2  ;;  %v2095_v22 = vshrl.u32 %v2864_v58, 16  ;;  %v1902_v28 = vrot.slane %v1853_v13, 2 }
 0x1af   : > { %2530 = vmatpush.bf16.msra.mxu2 %v2995_v52  ;;  %v1766_v23 = vsel %vm1080_vm7, %v1763_v7, %v1765_v11  ;;  %v1818_v25 = vadd.f32 %v1764_v18, %v1681_v9  ;;  %v1899_v26 = vrot.slane %v1851_v12, 2  ;;  %v2098_v34 = vshll.u32 %v2864_v58, 16 }
 0x1b0   : > { %2481 = vmatpush.bf16.msrb.mxu1 %v2987_v53  ;;  %v1819_v30 = vadd.f32 %v1766_v23, %v1682_v16  ;;  %v2097_v32 = vrot.slane %v2095_v22, 4  ;;  %v2104_v37 = vshll.u32 %v2865_v15, 16  ;;  %v1903_v39 = vsel %vm1218_vm8, %v1900_v19, %v1902_v28  ;;  %v1358_v23 = vld [vmem:[#allocation2 + $0x28] sm:$0x1] }
 0x1b1   : > { %v1901_v38 = vsel %vm1218_vm8, %v1899_v26, %v1900_v19  ;;  %v2108_v41 = vshrl.u32 %v2865_v15, 16  ;;  %v2114_v42 = vshll.u32 %v2866_v21, 16  ;;  %v2100_v57 = vrot.slane %v2098_v34, 5 }
 0x1b2   : > { %2531 = vmatmul.bf16.vlgmr.msra.gmra.mxu2 %v2326_v29  ;;  %v1955_v45 = vadd.f32 %v1901_v38, %v1818_v25  ;;  %v1956_v46 = vadd.f32 %v1903_v39, %v1819_v30  ;;  %v2106_v59 = vrot.slane %v2104_v37, 5  ;;  %v1154_v29 = vld [vmem:[#allocation2 + $0x10] sm:$0xe]  ;;  %v985_v52 = vmul.f32 %v4046_v1, %v4015_v27  ;;  %v1495_v39 = vld [vmem:[#allocation2 + $0x20] sm:$0xe] }
 0x1b3   : > { %v2110_v47 = vrot.slane %v2108_v41, 4  ;;  %v2116_v50 = vrot.slane %v2114_v42, 5  ;;  %v986_v53 = vmul.f32 %v4051_v4, %v4015_v27  ;;  %v2101_v56 = vor.u32 %v2100_v57, %v2097_v32 }
 0x1b4   : > { %v1975_v54 = vadd.f32 %v4117_v31, %v1955_v45  ;;  %v1976_v55 = vadd.f32 %v4117_v31, %v1956_v46  ;;  %v1024_v60 = vunpack.c.l.bf16 %v1016_v44  ;;  %v1035_v17 = vmul.f32 %v4046_v1, %v4018_v35 }
 0x1b5   : > { %v2111_v61 = vor.u32 %v2110_v47, %v2106_v59  ;;  %v1036_v62 = vmul.f32 %v4051_v4, %v4018_v35  ;;  %v1162_v63 = vunpack.c.l.bf16 %v1154_v29  ;;  %v2102_v3 = vrot.slane %v2101_v56, 4 }
 0x1b6   : > { %v1991_v0 = vmax.f32 %v1975_v54, 0.0  ;;  %v1992_v2 = vmax.f32 %v1976_v55, 0.0  ;;  %v1037_v49 = vmul.f32 %v4018_v35, %v1024_v60  ;;  %v1086_v5 = vrot.slane %v1035_v17, 1 }
 0x1b7   : > { %v2112_v58 = vrot.slane %v2111_v61, 4  ;;  %v1087_v6 = vrot.slane %v1036_v62, 1  ;;  %v1173_v7 = vmul.f32 %v4029_v40, %v1162_v63  ;;  %v2107_v11 = vsel %vm4022_vm9, %v2102_v3, %v2106_v59 }
 0x1b8   : > { %v2007_v8 = vmin.f32 %v1991_v0, 6.0  ;;  %v2008_v9 = vmin.f32 %v1992_v2, 6.0  ;;  %v1089_v1 = vrot.slane %v1037_v49, 1  ;;  %v2312_v13 = vunpack.c.l.b16 %v2107_v11  ;;  %v1698_v0 = vld [vmem:[#allocation2 + $0x38] sm:$0x1] }
 0x1b9   : > { %v2117_v12 = vsel %vm4022_vm9, %v2112_v58, %v2116_v50  ;;  %v1088_v15 = vsel %vm1080_vm7, %v1086_v5, %v1087_v6  ;;  %v1174_v16 = vmul.f32 %v4051_v4, %v4029_v40  ;;  %v1175_v28 = vmul.f32 %v4029_v40, %v1024_v60  ;;  %v1835_v5 = vld [vmem:[#allocation2 + $0x30] sm:$0xe] }
 0x1ba   : > { %v2023_v18 = vpack.c.bf16 %v2007_v8, %v2007_v8  ;;  %v2024_v19 = vpack.c.bf16 %v2008_v9, %v2008_v9  ;;  %v2313_v21 = vunpack.c.l.b16 %v2117_v12  ;;  %v1090_v22 = vsel %vm1080_vm7, %v1087_v6, %v1089_v1 }
 0x1bb   : > { %v1139_v25 = vadd.f32 %v1088_v15, %v985_v52  ;;  %v1140_v26 = vadd.f32 %v1090_v22, %v986_v53  ;;  %v1224_v30 = vrot.slane %v1173_v7, 2  ;;  %v1225_v38 = vrot.slane %v1174_v16, 2  ;;  %v3233_v53 = vld [vmem:[#allocation2 + $0x30] sm:$0xff]  }
 0x1bc   : > { %v2278_v32 = vunpack.c.l.b16 %v2023_v18  ;;  %v2279_v34 = vunpack.c.l.b16 %v2024_v19  ;;  %v2327_v37 = vpack.c.b16 %v2313_v21, %v2312_v13  ;;  %v1227_v41 = vrot.slane %v1175_v28, 2 }
 0x1bd   : > { %v1327_v4 = vmul.f32 %v4073_v24, %v4056_v10  ;;  %v1328_v42 = vmul.f32 %v4076_v33, %v4056_v10  ;;  %v1366_v44 = vunpack.c.l.bf16 %v1358_v23  ;;  %v1226_v46 = vsel %vm1218_vm8, %v1224_v30, %v1225_v38 }
 0x1be   : > { %v2294_v45 = vpack.c.b16 %v2279_v34, %v2278_v32  ;;  %v1377_v57 = vmul.f32 %v4073_v24, %v4059_v14  ;;  %v1378_v59 = vmul.f32 %v4076_v33, %v4059_v14  ;;  %v1228_v29 = vsel %vm1218_vm8, %v1225_v38, %v1227_v41 }
 0x1bf   : > { %v1277_v47 = vadd.f32 %v1226_v46, %v1139_v25  ;;  %v1379_v50 = vmul.f32 %v4059_v14, %v1366_v44  ;;  %v1503_v52 = vunpack.c.l.bf16 %v1495_v39  ;;  %v1278_v54 = vadd.f32 %v1228_v29, %v1140_v26  ;;  %v2867_v26 = vld [vmem:[%s3887_s14 + $0x30] sm:$0xf]  ;;  %v2869_v29 = vld [vmem:[%s3887_s14 + $0x38] sm:$0x1] }
 0x1c0   : > { %2482 = vmatmul.bf16.vlgmr.msrb.gmra.mxu1 %v2294_v45  ;;  %v1427_v55 = vrot.slane %v1377_v57, 1  ;;  %v1428_v56 = vrot.slane %v1378_v59, 1  ;;  %v1515_v60 = vmul.f32 %v4076_v33, %v4066_v20  ;;  %v1516_v63 = vmul.f32 %v4066_v20, %v1366_v44 }
 0x1c1   : > { %v1343_v61 = vadd.f32 %v1327_v4, %v1277_v47  ;;  %v1430_v17 = vrot.slane %v1379_v50, 1  ;;  %v1514_v62 = vmul.f32 %v4066_v20, %v1503_v52  ;;  %v1344_v2 = vadd.f32 %v1328_v42, %v1278_v54 }
 0x1c2   : > { %2536 = vmatmul.bf16.gmra.mxu2 %v2327_v37  ;;  %v1429_v3 = vsel %vm1080_vm7, %v1427_v55, %v1428_v56  ;;  %v1565_v49 = vrot.slane %v1515_v60, 2  ;;  %v4158_v58 = vunpack.c.l.bf16 %v3233_v53  ;;  %v1567_v9 = vrot.slane %v1516_v63, 2  ;;  %v2868_v37 = vld [vmem:[%s3887_s14 + $0x34] sm:$0xf] }
 0x1c3   : > { %v1431_v6 = vsel %vm1080_vm7, %v1428_v56, %v1430_v17  ;;  %v1480_v7 = vadd.f32 %v1429_v3, %v1343_v61  ;;  %v1564_v8 = vrot.slane %v1514_v62, 2  ;;  %v4161_v1 = vunpack.c.h.bf16 %v3233_v53  ;;  %v1017_v56 = vld [vmem:[#allocation2 + $0x28] sm:$0x1] }
 0x1c4   : > { %v1481_v11 = vadd.f32 %v1431_v6, %v1344_v2  ;;  %v1667_v12 = vmul.f32 %v4158_v58, %v4082_v43  ;;  %v1706_v13 = vunpack.c.l.bf16 %v1698_v0  ;;  %v1568_v16 = vsel %vm1218_vm8, %v1565_v49, %v1567_v9 }
 0x1c5   : > { %v1566_v15 = vsel %vm1218_vm8, %v1564_v8, %v1565_v49  ;;  %v1717_v18 = vmul.f32 %v4158_v58, %v4087_v48  ;;  %v1843_v19 = vunpack.c.l.bf16 %v1835_v5  ;;  %v1668_v23 = vmul.f32 %v4161_v1, %v4082_v43  ;;  %v1155_v8 = vld [vmem:[#allocation2 + $0x20] sm:$0xe] }
 0x1c6   : > { %v1617_v21 = vadd.f32 %v1566_v15, %v1480_v7  ;;  %v1618_v22 = vadd.f32 %v1568_v16, %v1481_v11  ;;  %v1718_v25 = vmul.f32 %v4161_v1, %v4087_v48  ;;  %v1719_v28 = vmul.f32 %v4087_v48, %v1706_v13 }
 0x1c7   : > { %v1767_v30 = vrot.slane %v1717_v18, 1  ;;  %v1854_v32 = vmul.f32 %v4089_v51, %v1843_v19  ;;  %v1855_v34 = vmul.f32 %v4089_v51, %v4161_v1  ;;  %v1856_v4 = vmul.f32 %v4089_v51, %v1706_v13 }
 0x1c8   : > { %v1683_v38 = vadd.f32 %v1667_v12, %v1617_v21  ;;  %v1684_v39 = vadd.f32 %v1668_v23, %v1618_v22  ;;  %v1768_v41 = vrot.slane %v1718_v25, 1  ;;  %v1770_v42 = vrot.slane %v1719_v28, 1 }
 0x1c9   : > { %v1904_v44 = vrot.slane %v1854_v32, 2  ;;  %v1905_v45 = vrot.slane %v1855_v34, 2  ;;  %v2119_v46 = vshrl.u32 %v2867_v26, 16  ;;  %v1907_v59 = vrot.slane %v1856_v4, 2 }
 0x1ca   : > { %v1769_v57 = vsel %vm1080_vm7, %v1767_v30, %v1768_v41  ;;  %v2122_v47 = vshll.u32 %v2867_v26, 16  ;;  %v2128_v50 = vshll.u32 %v2868_v37, 16  ;;  %v1771_v52 = vsel %vm1080_vm7, %v1768_v41, %v1770_v42 }
 0x1cb   : > { %v1820_v53 = vadd.f32 %v1769_v57, %v1683_v38  ;;  %v1906_v54 = vsel %vm1218_vm8, %v1904_v44, %v1905_v45  ;;  %v2121_v55 = vrot.slane %v2119_v46, 4  ;;  %v1821_v60 = vadd.f32 %v1771_v52, %v1684_v39 }
 0x1cc   : > { %v1908_v61 = vsel %vm1218_vm8, %v1905_v45, %v1907_v59  ;;  %v2124_v17 = vrot.slane %v2122_v47, 5  ;;  %v2130_v62 = vrot.slane %v2128_v50, 5  ;;  %v2132_v0 = vshrl.u32 %v2868_v37, 16  ;;  %v1359_v59 = vld [vmem:[#allocation2 + $0x38] sm:$0x1] }
 0x1cd   : > { %v1957_v63 = vadd.f32 %v1906_v54, %v1820_v53  ;;  %v2138_v2 = vshll.u32 %v2869_v29, 16  ;;  %v987_v3 = vmul.f32 %v4073_v24, %v4015_v27  ;;  %v1958_v49 = vadd.f32 %v1908_v61, %v1821_v60  ;;  %v1496_v53 = vld [vmem:[#allocation2 + $0x30] sm:$0xe] }
 0x1ce   : > { %v2125_v5 = vor.u32 %v2124_v17, %v2121_v55  ;;  %v988_v6 = vmul.f32 %v4076_v33, %v4015_v27  ;;  %v1025_v7 = vunpack.c.l.bf16 %v1017_v56  ;;  %v2134_v11 = vrot.slane %v2132_v0, 4 }
 0x1cf   : > { %v1977_v9 = vadd.f32 %v4117_v31, %v1957_v63  ;;  %v2140_v12 = vrot.slane %v2138_v2, 5  ;;  %v1038_v13 = vmul.f32 %v4073_v24, %v4018_v35  ;;  %v1978_v15 = vadd.f32 %v4117_v31, %v1958_v49 }
 0x1d0   : > { %v2126_v16 = vrot.slane %v2125_v5, 4  ;;  %v1039_v18 = vmul.f32 %v4076_v33, %v4018_v35  ;;  %v1040_v19 = vmul.f32 %v4018_v35, %v1025_v7  ;;  %v2135_v22 = vor.u32 %v2134_v11, %v2130_v62 }
 0x1d1   : > { %v1993_v21 = vmax.f32 %v1977_v9, 0.0  ;;  %v1091_v23 = vrot.slane %v1038_v13, 1  ;;  %v1163_v25 = vunpack.c.l.bf16 %v1155_v8  ;;  %v1994_v26 = vmax.f32 %v1978_v15, 0.0  ;;  %v3234_v8 = vld [vmem:[#allocation2 + $0x40] sm:$0xff]  }
 0x1d2   : > { %v2131_v28 = vsel %vm4022_vm9, %v2126_v16, %v2130_v62  ;;  %v1092_v30 = vrot.slane %v1039_v18, 1  ;;  %v1094_v32 = vrot.slane %v1040_v19, 1  ;;  %v2136_v24 = vrot.slane %v2135_v22, 4 }
 0x1d3   : > { %v2009_v34 = vmin.f32 %v1993_v21, 6.0  ;;  %v2314_v37 = vunpack.c.l.b16 %v2131_v28  ;;  %v1176_v38 = vmul.f32 %v4029_v40, %v1163_v25  ;;  %v2010_v39 = vmin.f32 %v1994_v26, 6.0  ;;  %v1699_v21 = vld [vmem:[#allocation2 + $0x48] sm:$0x1]  ;;  %v1836_v28 = vld [vmem:[#allocation2 + $0x40] sm:$0xe] }
 0x1d4   : > { %v1093_v41 = vsel %vm1080_vm7, %v1091_v23, %v1092_v30  ;;  %v1095_v4 = vsel %vm1080_vm7, %v1092_v30, %v1094_v32  ;;  %v1177_v42 = vmul.f32 %v4076_v33, %v4029_v40  ;;  %v2141_v45 = vsel %vm4022_vm9, %v2136_v24, %v2140_v12 }
 0x1d5   : > { %v2025_v44 = vpack.c.bf16 %v2009_v34, %v2009_v34  ;;  %v1141_v46 = vadd.f32 %v1093_v41, %v987_v3  ;;  %v1142_v57 = vadd.f32 %v1095_v4, %v988_v6  ;;  %v2026_v29 = vpack.c.bf16 %v2010_v39, %v2010_v39 }
 0x1d6   : > { %v2315_v47 = vunpack.c.l.b16 %v2141_v45  ;;  %v1178_v50 = vmul.f32 %v4029_v40, %v1025_v7  ;;  %v1229_v52 = vrot.slane %v1176_v38, 2  ;;  %v1230_v55 = vrot.slane %v1177_v42, 2 }
 0x1d7   : > { %v2280_v54 = vunpack.c.l.b16 %v2025_v44  ;;  %v1329_v56 = vmul.f32 %v4158_v58, %v4056_v10  ;;  %v1330_v33 = vmul.f32 %v4161_v1, %v4056_v10  ;;  %v2281_v60 = vunpack.c.l.b16 %v2026_v29 }
 0x1d8   : > { %v2328_v61 = vpack.c.b16 %v2315_v47, %v2314_v37  ;;  %v1232_v17 = vrot.slane %v1178_v50, 2  ;;  %v1367_v62 = vunpack.c.l.bf16 %v1359_v59  ;;  %v1231_v63 = vsel %vm1218_vm8, %v1229_v52, %v1230_v55  ;;  %v2870_v47 = vld [vmem:[%s3887_s14 + $0x40] sm:$0xf] }
 0x1d9   : > { %v1380_v0 = vmul.f32 %v4158_v58, %v4059_v14  ;;  %v1381_v2 = vmul.f32 %v4161_v1, %v4059_v14  ;;  %v1504_v3 = vunpack.c.l.bf16 %v1496_v53  ;;  %v2295_v49 = vpack.c.b16 %v2281_v60, %v2280_v54 }
 0x1da   : > { %2541 = vmatmul.bf16.gmra.mxu2 %v2328_v61  ;;  %v1233_v5 = vsel %vm1218_vm8, %v1230_v55, %v1232_v17  ;;  %v1279_v6 = vadd.f32 %v1231_v63, %v1141_v46  ;;  %v1382_v7 = vmul.f32 %v4059_v14, %v1367_v62  ;;  %v1518_v18 = vmul.f32 %v4161_v1, %v4066_v20  ;;  %v2871_v55 = vld [vmem:[%s3887_s14 + $0x44] sm:$0xf] }
 0x1db   : > { %v1280_v9 = vadd.f32 %v1233_v5, %v1142_v57  ;;  %v1432_v11 = vrot.slane %v1380_v0, 1  ;;  %v1433_v12 = vrot.slane %v1381_v2, 1  ;;  %v1517_v13 = vmul.f32 %v4066_v20, %v1504_v3  ;;  %2487 = vmatmul.bf16.gmra.mxu1 %v2295_v49  ;;  %v2872_v49 = vld [vmem:[%s3887_s14 + $0x48] sm:$0x1] }
 0x1dc   : > { %v1345_v15 = vadd.f32 %v1329_v56, %v1279_v6  ;;  %v1435_v16 = vrot.slane %v1382_v7, 1  ;;  %v1519_v19 = vmul.f32 %v4066_v20, %v1367_v62  ;;  %v4222_v26 = vunpack.c.l.bf16 %v3234_v8 }
 0x1dd   : > { %v1346_v22 = vadd.f32 %v1330_v33, %v1280_v9  ;;  %v1434_v23 = vsel %vm1080_vm7, %v1432_v11, %v1433_v12  ;;  %v1569_v25 = vrot.slane %v1517_v13, 2  ;;  %v1570_v34 = vrot.slane %v1518_v18, 2 }
 0x1de   : > { %v1436_v30 = vsel %vm1080_vm7, %v1433_v12, %v1435_v16  ;;  %v1482_v32 = vadd.f32 %v1434_v23, %v1345_v15  ;;  %v1572_v24 = vrot.slane %v1519_v19, 2  ;;  %v4225_v38 = vunpack.c.h.bf16 %v3234_v8  ;;  %v1018_v12 = vld [vmem:[#allocation2 + $0x38] sm:$0x1] }
 0x1df   : > { %v1483_v37 = vadd.f32 %v1436_v30, %v1346_v22  ;;  %v1669_v39 = vmul.f32 %v4222_v26, %v4082_v43  ;;  %v1707_v41 = vunpack.c.l.bf16 %v1699_v21  ;;  %v1571_v4 = vsel %vm1218_vm8, %v1569_v25, %v1570_v34 }
 0x1e0   : > { %v1573_v42 = vsel %vm1218_vm8, %v1570_v34, %v1572_v24  ;;  %v1720_v44 = vmul.f32 %v4222_v26, %v4087_v48  ;;  %v1844_v45 = vunpack.c.l.bf16 %v1836_v28  ;;  %v1619_v46 = vadd.f32 %v1571_v4, %v1482_v32  ;;  %v1156_v34 = vld [vmem:[#allocation2 + $0x30] sm:$0xe] }
 0x1e1   : > { %v1620_v57 = vadd.f32 %v1573_v42, %v1483_v37  ;;  %v1670_v59 = vmul.f32 %v4225_v38, %v4082_v43  ;;  %v1721_v29 = vmul.f32 %v4225_v38, %v4087_v48  ;;  %v1722_v50 = vmul.f32 %v4087_v48, %v1707_v41 }
 0x1e2   : > { %v1772_v52 = vrot.slane %v1720_v44, 1  ;;  %v1857_v53 = vmul.f32 %v4089_v51, %v1844_v45  ;;  %v1858_v54 = vmul.f32 %v4089_v51, %v4225_v38  ;;  %v1685_v56 = vadd.f32 %v1669_v39, %v1619_v46 }
 0x1e3   : > { %v1686_v33 = vadd.f32 %v1670_v59, %v1620_v57  ;;  %v1773_v60 = vrot.slane %v1721_v29, 1  ;;  %v1859_v61 = vmul.f32 %v4089_v51, %v1707_v41  ;;  %v1775_v17 = vrot.slane %v1722_v50, 1 }
 0x1e4   : > { %v1909_v62 = vrot.slane %v1857_v53, 2  ;;  %v1910_v63 = vrot.slane %v1858_v54, 2  ;;  %v2143_v0 = vshrl.u32 %v2870_v47, 16  ;;  %v2146_v5 = vshll.u32 %v2870_v47, 16 }
 0x1e5   : > { %v1774_v2 = vsel %vm1080_vm7, %v1772_v52, %v1773_v60  ;;  %v1912_v3 = vrot.slane %v1859_v61, 2  ;;  %v2152_v6 = vshll.u32 %v2871_v55, 16  ;;  %v1776_v7 = vsel %vm1080_vm7, %v1773_v60, %v1775_v17 }
 0x1e6   : > { %v1822_v8 = vadd.f32 %v1774_v2, %v1685_v56  ;;  %v1911_v9 = vsel %vm1218_vm8, %v1909_v62, %v1910_v63  ;;  %v2145_v11 = vrot.slane %v2143_v0, 4  ;;  %v1823_v13 = vadd.f32 %v1776_v7, %v1686_v33 }
 0x1e7   : > { %v1913_v15 = vsel %vm1218_vm8, %v1910_v63, %v1912_v3  ;;  %v2148_v16 = vrot.slane %v2146_v5, 5  ;;  %v2154_v18 = vrot.slane %v2152_v6, 5  ;;  %v2156_v21 = vshrl.u32 %v2871_v55, 16  ;;  %v1360_v3 = vld [vmem:[#allocation2 + $0x48] sm:$0x1] }
 0x1e8   : > { %v1959_v19 = vadd.f32 %v1911_v9, %v1822_v8  ;;  %v2162_v22 = vshll.u32 %v2872_v49, 16  ;;  %v989_v23 = vmul.f32 %v4158_v58, %v4015_v27  ;;  %v1960_v25 = vadd.f32 %v1913_v15, %v1823_v13  ;;  %v1497_v8 = vld [vmem:[#allocation2 + $0x40] sm:$0xe] }
 0x1e9   : > { %v2149_v28 = vor.u32 %v2148_v16, %v2145_v11  ;;  %v990_v30 = vmul.f32 %v4161_v1, %v4015_v27  ;;  %v1026_v32 = vunpack.c.l.bf16 %v1018_v12  ;;  %v2158_v37 = vrot.slane %v2156_v21, 4 }
 0x1ea   : > { %v1979_v24 = vadd.f32 %v4117_v31, %v1959_v19  ;;  %v2164_v39 = vrot.slane %v2162_v22, 5  ;;  %v1041_v41 = vmul.f32 %v4158_v58, %v4018_v35  ;;  %v1980_v4 = vadd.f32 %v4117_v31, %v1960_v25 }
 0x1eb   : > { %v2150_v42 = vrot.slane %v2149_v28, 4  ;;  %v1042_v44 = vmul.f32 %v4161_v1, %v4018_v35  ;;  %v1043_v45 = vmul.f32 %v4018_v35, %v1026_v32  ;;  %v2159_v57 = vor.u32 %v2158_v37, %v2154_v18 }
 0x1ec   : > { %v1995_v46 = vmax.f32 %v1979_v24, 0.0  ;;  %v1096_v59 = vrot.slane %v1041_v41, 1  ;;  %v1164_v29 = vunpack.c.l.bf16 %v1156_v34  ;;  %v1996_v47 = vmax.f32 %v1980_v4, 0.0  ;;  %v3235_v34 = vld [vmem:[#allocation2 + $0x50] sm:$0xff]  }
 0x1ed   : > { %v2155_v50 = vsel %vm4022_vm9, %v2150_v42, %v2154_v18  ;;  %v1097_v52 = vrot.slane %v1042_v44, 1  ;;  %v1099_v53 = vrot.slane %v1043_v45, 1  ;;  %v2160_v58 = vrot.slane %v2159_v57, 4 }
 0x1ee   : > { %v2011_v54 = vmin.f32 %v1995_v46, 6.0  ;;  %v2316_v55 = vunpack.c.l.b16 %v2155_v50  ;;  %v1179_v56 = vmul.f32 %v4029_v40, %v1164_v29  ;;  %v2012_v33 = vmin.f32 %v1996_v47, 6.0  ;;  %v1700_v46 = vld [vmem:[#allocation2 + $0x58] sm:$0x1]  ;;  %v1837_v50 = vld [vmem:[#allocation2 + $0x50] sm:$0xe] }
 0x1ef   : > { %v1098_v60 = vsel %vm1080_vm7, %v1096_v59, %v1097_v52  ;;  %v1100_v61 = vsel %vm1080_vm7, %v1097_v52, %v1099_v53  ;;  %v1180_v17 = vmul.f32 %v4161_v1, %v4029_v40  ;;  %v2165_v63 = vsel %vm4022_vm9, %v2160_v58, %v2164_v39 }
 0x1f0   : > { %v2027_v62 = vpack.c.bf16 %v2011_v54, %v2011_v54  ;;  %v1143_v0 = vadd.f32 %v1098_v60, %v989_v23  ;;  %v1144_v2 = vadd.f32 %v1100_v61, %v990_v30  ;;  %v2028_v49 = vpack.c.bf16 %v2012_v33, %v2012_v33 }
 0x1f1   : > { %v2317_v5 = vunpack.c.l.b16 %v2165_v63  ;;  %v1181_v6 = vmul.f32 %v4029_v40, %v1026_v32  ;;  %v1234_v7 = vrot.slane %v1179_v56, 2  ;;  %v1235_v11 = vrot.slane %v1180_v17, 2 }
 0x1f2   : > { %v2282_v9 = vunpack.c.l.b16 %v2027_v62  ;;  %v1331_v12 = vmul.f32 %v4222_v26, %v4056_v10  ;;  %v1332_v1 = vmul.f32 %v4225_v38, %v4056_v10  ;;  %v2283_v13 = vunpack.c.l.b16 %v2028_v49 }
 0x1f3   : > { %v2329_v15 = vpack.c.b16 %v2317_v5, %v2316_v55  ;;  %v1237_v16 = vrot.slane %v1181_v6, 2  ;;  %v1368_v18 = vunpack.c.l.bf16 %v1360_v3  ;;  %v1236_v19 = vsel %vm1218_vm8, %v1234_v7, %v1235_v11  ;;  %v2873_v5 = vld [vmem:[%s3887_s14 + $0x50] sm:$0xf] }
 0x1f4   : > { %v1383_v21 = vmul.f32 %v4222_v26, %v4059_v14  ;;  %v1384_v22 = vmul.f32 %v4225_v38, %v4059_v14  ;;  %v1505_v23 = vunpack.c.l.bf16 %v1497_v8  ;;  %v2296_v25 = vpack.c.b16 %v2283_v13, %v2282_v9 }
 0x1f5   : > { %2546 = vmatmul.bf16.gmra.mxu2 %v2329_v15  ;;  %v1238_v28 = vsel %vm1218_vm8, %v1235_v11, %v1237_v16  ;;  %v1281_v30 = vadd.f32 %v1236_v19, %v1143_v0  ;;  %v1385_v32 = vmul.f32 %v4059_v14, %v1368_v18  ;;  %v1521_v44 = vmul.f32 %v4225_v38, %v4066_v20  ;;  %v2874_v11 = vld [vmem:[%s3887_s14 + $0x54] sm:$0xf] }
 0x1f6   : > { %v1282_v24 = vadd.f32 %v1238_v28, %v1144_v2  ;;  %v1437_v37 = vrot.slane %v1383_v21, 1  ;;  %v1438_v39 = vrot.slane %v1384_v22, 1  ;;  %v1520_v41 = vmul.f32 %v4066_v20, %v1505_v23  ;;  %2492 = vmatmul.bf16.gmra.mxu1 %v2296_v25  ;;  %v2875_v25 = vld [vmem:[%s3887_s14 + $0x58] sm:$0x1] }
 0x1f7   : > { %v1347_v4 = vadd.f32 %v1331_v12, %v1281_v30  ;;  %v1440_v42 = vrot.slane %v1385_v32, 1  ;;  %v1522_v45 = vmul.f32 %v4066_v20, %v1368_v18  ;;  %v4286_v47 = vunpack.c.l.bf16 %v3235_v34 }
 0x1f8   : > { %v1348_v57 = vadd.f32 %v1332_v1, %v1282_v24  ;;  %v1439_v59 = vsel %vm1080_vm7, %v1437_v37, %v1438_v39  ;;  %v1574_v29 = vrot.slane %v1520_v41, 2  ;;  %v1575_v54 = vrot.slane %v1521_v44, 2 }
 0x1f9   : > { %v1441_v52 = vsel %vm1080_vm7, %v1438_v39, %v1440_v42  ;;  %v1484_v53 = vadd.f32 %v1439_v59, %v1347_v4  ;;  %v1577_v58 = vrot.slane %v1522_v45, 2  ;;  %v4289_v56 = vunpack.c.h.bf16 %v3235_v34  ;;  %v1019_v39 = vld [vmem:[#allocation2 + $0x48] sm:$0x1] }
 0x1fa   : > { %v1485_v55 = vadd.f32 %v1441_v52, %v1348_v57  ;;  %v1671_v33 = vmul.f32 %v4286_v47, %v4082_v43  ;;  %v1708_v60 = vunpack.c.l.bf16 %v1700_v46  ;;  %v1576_v61 = vsel %vm1218_vm8, %v1574_v29, %v1575_v54 }
 0x1fb   : > { %v1578_v17 = vsel %vm1218_vm8, %v1575_v54, %v1577_v58  ;;  %v1723_v62 = vmul.f32 %v4286_v47, %v4087_v48  ;;  %v1845_v63 = vunpack.c.l.bf16 %v1837_v50  ;;  %v1621_v0 = vadd.f32 %v1576_v61, %v1484_v53  ;;  %v1157_v54 = vld [vmem:[#allocation2 + $0x40] sm:$0xe] }
 0x1fc   : > { %v1622_v2 = vadd.f32 %v1578_v17, %v1485_v55  ;;  %v1672_v3 = vmul.f32 %v4289_v56, %v4082_v43  ;;  %v1724_v49 = vmul.f32 %v4289_v56, %v4087_v48  ;;  %v1725_v6 = vmul.f32 %v4087_v48, %v1708_v60 }
 0x1fd   : > { %v1777_v7 = vrot.slane %v1723_v62, 1  ;;  %v1860_v8 = vmul.f32 %v4089_v51, %v1845_v63  ;;  %v1861_v9 = vmul.f32 %v4089_v51, %v4289_v56  ;;  %v1687_v12 = vadd.f32 %v1671_v33, %v1621_v0 }
 0x1fe   : > { %v1688_v1 = vadd.f32 %v1672_v3, %v1622_v2  ;;  %v1778_v13 = vrot.slane %v1724_v49, 1  ;;  %v1862_v15 = vmul.f32 %v4089_v51, %v1708_v60  ;;  %v1780_v16 = vrot.slane %v1725_v6, 1 }
 0x1ff   : > { %v1914_v18 = vrot.slane %v1860_v8, 2  ;;  %v1915_v19 = vrot.slane %v1861_v9, 2  ;;  %v2167_v21 = vshrl.u32 %v2873_v5, 16  ;;  %v2170_v28 = vshll.u32 %v2873_v5, 16 }
 0x200   : > { %v1779_v22 = vsel %vm1080_vm7, %v1777_v7, %v1778_v13  ;;  %v1917_v23 = vrot.slane %v1862_v15, 2  ;;  %v2176_v30 = vshll.u32 %v2874_v11, 16  ;;  %v1781_v32 = vsel %vm1080_vm7, %v1778_v13, %v1780_v16 }
 0x201   : > { %v1824_v34 = vadd.f32 %v1779_v22, %v1687_v12  ;;  %v1916_v24 = vsel %vm1218_vm8, %v1914_v18, %v1915_v19  ;;  %v2169_v37 = vrot.slane %v2167_v21, 4  ;;  %v1825_v41 = vadd.f32 %v1781_v32, %v1688_v1 }
 0x202   : > { %v1918_v4 = vsel %vm1218_vm8, %v1915_v19, %v1917_v23  ;;  %v2172_v42 = vrot.slane %v2170_v28, 5  ;;  %v2178_v44 = vrot.slane %v2176_v30, 5  ;;  %v2180_v46 = vshrl.u32 %v2874_v11, 16  ;;  %v1361_v23 = vld [vmem:[#allocation2 + $0x58] sm:$0x1] }
 0x203   : > { %v1961_v45 = vadd.f32 %v1916_v24, %v1824_v34  ;;  %v2186_v57 = vshll.u32 %v2875_v25, 16  ;;  %v991_v59 = vmul.f32 %v4222_v26, %v4015_v27  ;;  %v1962_v29 = vadd.f32 %v1918_v4, %v1825_v41  ;;  %v1498_v34 = vld [vmem:[#allocation2 + $0x50] sm:$0xe] }
 0x204   : > { %v2173_v50 = vor.u32 %v2172_v42, %v2169_v37  ;;  %v992_v52 = vmul.f32 %v4225_v38, %v4015_v27  ;;  %v1027_v53 = vunpack.c.l.bf16 %v1019_v39  ;;  %v2182_v55 = vrot.slane %v2180_v46, 4 }
 0x205   : > { %v1981_v58 = vadd.f32 %v4117_v31, %v1961_v45  ;;  %v2188_v33 = vrot.slane %v2186_v57, 5  ;;  %v1044_v60 = vmul.f32 %v4222_v26, %v4018_v35  ;;  %v1982_v61 = vadd.f32 %v4117_v31, %v1962_v29 }
 0x206   : > { %v2174_v17 = vrot.slane %v2173_v50, 4  ;;  %v1045_v62 = vmul.f32 %v4225_v38, %v4018_v35  ;;  %v1046_v63 = vmul.f32 %v4018_v35, %v1027_v53  ;;  %v2183_v2 = vor.u32 %v2182_v55, %v2178_v44 }
 0x207   : > { %v1997_v0 = vmax.f32 %v1981_v58, 0.0  ;;  %v1101_v3 = vrot.slane %v1044_v60, 1  ;;  %v1165_v49 = vunpack.c.l.bf16 %v1157_v54  ;;  %v1998_v5 = vmax.f32 %v1982_v61, 0.0  ;;  %v3236_v54 = vld [vmem:[#allocation2 + $0x60] sm:$0xff]  }
 0x208   : > { %v2179_v6 = vsel %vm4022_vm9, %v2174_v17, %v2178_v44  ;;  %v1102_v7 = vrot.slane %v1045_v62, 1  ;;  %v1104_v8 = vrot.slane %v1046_v63, 1  ;;  %v2184_v26 = vrot.slane %v2183_v2, 4 }
 0x209   : > { %v2013_v9 = vmin.f32 %v1997_v0, 6.0  ;;  %v2318_v11 = vunpack.c.l.b16 %v2179_v6  ;;  %v1182_v12 = vmul.f32 %v4029_v40, %v1165_v49  ;;  %v2014_v1 = vmin.f32 %v1998_v5, 6.0  ;;  %v1701_v0 = vld [vmem:[#allocation2 + $0x68] sm:$0x1]  ;;  %v1838_v6 = vld [vmem:[#allocation2 + $0x60] sm:$0xe] }
 0x20a   : > { %v1103_v13 = vsel %vm1080_vm7, %v1101_v3, %v1102_v7  ;;  %v1105_v15 = vsel %vm1080_vm7, %v1102_v7, %v1104_v8  ;;  %v1183_v16 = vmul.f32 %v4225_v38, %v4029_v40  ;;  %v2189_v19 = vsel %vm4022_vm9, %v2184_v26, %v2188_v33 }
 0x20b   : > { %v2029_v18 = vpack.c.bf16 %v2013_v9, %v2013_v9  ;;  %v1145_v21 = vadd.f32 %v1103_v13, %v991_v59  ;;  %v1146_v22 = vadd.f32 %v1105_v15, %v992_v52  ;;  %v2030_v25 = vpack.c.bf16 %v2014_v1, %v2014_v1 }
 0x20c   : > { %v2319_v28 = vunpack.c.l.b16 %v2189_v19  ;;  %v1184_v30 = vmul.f32 %v4029_v40, %v1027_v53  ;;  %v1239_v32 = vrot.slane %v1182_v12, 2  ;;  %v1240_v37 = vrot.slane %v1183_v16, 2 }
 0x20d   : > { %v2284_v24 = vunpack.c.l.b16 %v2029_v18  ;;  %v1333_v39 = vmul.f32 %v4286_v47, %v4056_v10  ;;  %v1334_v38 = vmul.f32 %v4289_v56, %v4056_v10  ;;  %v2285_v41 = vunpack.c.l.b16 %v2030_v25 }
 0x20e   : > { %v2330_v4 = vpack.c.b16 %v2319_v28, %v2318_v11  ;;  %v1242_v42 = vrot.slane %v1184_v30, 2  ;;  %v1369_v44 = vunpack.c.l.bf16 %v1361_v23  ;;  %v1241_v45 = vsel %vm1218_vm8, %v1239_v32, %v1240_v37  ;;  %v2876_v28 = vld [vmem:[%s3887_s14 + $0x60] sm:$0xf] }
 0x20f   : > { %v1386_v46 = vmul.f32 %v4286_v47, %v4059_v14  ;;  %v1387_v57 = vmul.f32 %v4289_v56, %v4059_v14  ;;  %v1506_v59 = vunpack.c.l.bf16 %v1498_v34  ;;  %v2297_v29 = vpack.c.b16 %v2285_v41, %v2284_v24 }
 0x210   : > { %2551 = vmatmul.bf16.gmra.mxu2 %v2330_v4  ;;  %v1243_v50 = vsel %vm1218_vm8, %v1240_v37, %v1242_v42  ;;  %v1283_v52 = vadd.f32 %v1241_v45, %v1145_v21  ;;  %v1388_v53 = vmul.f32 %v4059_v14, %v1369_v44  ;;  %v1524_v62 = vmul.f32 %v4289_v56, %v4066_v20  ;;  %v2877_v37 = vld [vmem:[%s3887_s14 + $0x64] sm:$0xf] }
 0x211   : > { %v1284_v58 = vadd.f32 %v1243_v50, %v1146_v22  ;;  %v1442_v55 = vrot.slane %v1386_v46, 1  ;;  %v1443_v33 = vrot.slane %v1387_v57, 1  ;;  %v1523_v60 = vmul.f32 %v4066_v20, %v1506_v59  ;;  %2497 = vmatmul.bf16.gmra.mxu1 %v2297_v29  ;;  %v2878_v29 = vld [vmem:[%s3887_s14 + $0x68] sm:$0x1] }
 0x212   : > { %v1349_v61 = vadd.f32 %v1333_v39, %v1283_v52  ;;  %v1445_v17 = vrot.slane %v1388_v53, 1  ;;  %v1525_v63 = vmul.f32 %v4066_v20, %v1369_v44  ;;  %v4350_v5 = vunpack.c.l.bf16 %v3236_v54 }
 0x213   : > { %v1350_v2 = vadd.f32 %v1334_v38, %v1284_v58  ;;  %v1444_v3 = vsel %vm1080_vm7, %v1442_v55, %v1443_v33  ;;  %v1579_v49 = vrot.slane %v1523_v60, 2  ;;  %v1580_v9 = vrot.slane %v1524_v62, 2 }
 0x214   : > { %v1446_v7 = vsel %vm1080_vm7, %v1443_v33, %v1445_v17  ;;  %v1486_v8 = vadd.f32 %v1444_v3, %v1349_v61  ;;  %v1582_v26 = vrot.slane %v1525_v63, 2  ;;  %v4353_v12 = vunpack.c.h.bf16 %v3236_v54  ;;  %v1020_v33 = vld [vmem:[#allocation2 + $0x58] sm:$0x1] }
 0x215   : > { %v1487_v11 = vadd.f32 %v1446_v7, %v1350_v2  ;;  %v1673_v1 = vmul.f32 %v4350_v5, %v4082_v43  ;;  %v1709_v13 = vunpack.c.l.bf16 %v1701_v0  ;;  %v1581_v15 = vsel %vm1218_vm8, %v1579_v49, %v1580_v9 }
 0x216   : > { %v1583_v16 = vsel %vm1218_vm8, %v1580_v9, %v1582_v26  ;;  %v1726_v18 = vmul.f32 %v4350_v5, %v4087_v48  ;;  %v1846_v19 = vunpack.c.l.bf16 %v1838_v6  ;;  %v1623_v21 = vadd.f32 %v1581_v15, %v1486_v8  ;;  %v1158_v8 = vld [vmem:[#allocation2 + $0x50] sm:$0xe] }
 0x217   : > { %v1624_v22 = vadd.f32 %v1583_v16, %v1487_v11  ;;  %v1674_v23 = vmul.f32 %v4353_v12, %v4082_v43  ;;  %v1727_v25 = vmul.f32 %v4353_v12, %v4087_v48  ;;  %v1728_v30 = vmul.f32 %v4087_v48, %v1709_v13 }
 0x218   : > { %v1782_v32 = vrot.slane %v1726_v18, 1  ;;  %v1863_v34 = vmul.f32 %v4089_v51, %v1846_v19  ;;  %v1864_v24 = vmul.f32 %v4089_v51, %v4353_v12  ;;  %v1689_v39 = vadd.f32 %v1673_v1, %v1623_v21 }
 0x219   : > { %v1690_v38 = vadd.f32 %v1674_v23, %v1624_v22  ;;  %v1783_v41 = vrot.slane %v1727_v25, 1  ;;  %v1865_v4 = vmul.f32 %v4089_v51, %v1709_v13  ;;  %v1785_v42 = vrot.slane %v1728_v30, 1 }
 0x21a   : > { %v1919_v44 = vrot.slane %v1863_v34, 2  ;;  %v1920_v45 = vrot.slane %v1864_v24, 2  ;;  %v2191_v46 = vshrl.u32 %v2876_v28, 16  ;;  %v2194_v50 = vshll.u32 %v2876_v28, 16 }
 0x21b   : > { %v1784_v57 = vsel %vm1080_vm7, %v1782_v32, %v1783_v41  ;;  %v1922_v59 = vrot.slane %v1865_v4, 2  ;;  %v2200_v52 = vshll.u32 %v2877_v37, 16  ;;  %v1786_v53 = vsel %vm1080_vm7, %v1783_v41, %v1785_v42 }
 0x21c   : > { %v1826_v54 = vadd.f32 %v1784_v57, %v1689_v39  ;;  %v1921_v58 = vsel %vm1218_vm8, %v1919_v44, %v1920_v45  ;;  %v2193_v55 = vrot.slane %v2191_v46, 4  ;;  %v1827_v60 = vadd.f32 %v1786_v53, %v1690_v38  ;;  %v1362_v46 = vld [vmem:[#allocation2 + $0x68] sm:$0x1] }
 0x21d   : > { %v1923_v51 = vsel %vm1218_vm8, %v1920_v45, %v1922_v59  ;;  %v2196_v61 = vrot.slane %v2194_v50, 5  ;;  %v2202_v17 = vrot.slane %v2200_v52, 5  ;;  %v2204_v63 = vshrl.u32 %v2877_v37, 16  ;;  %v1499_v52 = vld [vmem:[#allocation2 + $0x60] sm:$0xe] }
 0x21e   : > { %v1963_v62 = vadd.f32 %v1921_v58, %v1826_v54  ;;  %v2210_v0 = vshll.u32 %v2878_v29, 16  ;;  %v993_v2 = vmul.f32 %v4286_v47, %v4015_v27  ;;  %v1964_v3 = vadd.f32 %v1923_v51, %v1827_v60 }
 0x21f   : > { %v2197_v49 = vor.u32 %v2196_v61, %v2193_v55  ;;  %v994_v6 = vmul.f32 %v4289_v56, %v4015_v27  ;;  %v1028_v7 = vunpack.c.l.bf16 %v1020_v33  ;;  %v2206_v26 = vrot.slane %v2204_v63, 4 }
 0x220   : > { %v1983_v9 = vadd.f32 %v4117_v31, %v1963_v62  ;;  %v2212_v11 = vrot.slane %v2210_v0, 5  ;;  %v1047_v1 = vmul.f32 %v4286_v47, %v4018_v35  ;;  %v1984_v13 = vadd.f32 %v4117_v31, %v1964_v3 }
 0x221   : > { %v2198_v15 = vrot.slane %v2197_v49, 4  ;;  %v1048_v16 = vmul.f32 %v4289_v56, %v4018_v35  ;;  %v1049_v18 = vmul.f32 %v4018_v35, %v1028_v7  ;;  %v2207_v21 = vor.u32 %v2206_v26, %v2202_v17 }
 0x222   : > { %v1999_v19 = vmax.f32 %v1983_v9, 0.0  ;;  %v1106_v22 = vrot.slane %v1047_v1, 1  ;;  %v1166_v23 = vunpack.c.l.bf16 %v1158_v8  ;;  %v2000_v25 = vmax.f32 %v1984_v13, 0.0 }
 0x223   : > { %v2203_v28 = vsel %vm4022_vm9, %v2198_v15, %v2202_v17  ;;  %v1107_v30 = vrot.slane %v1048_v16, 1  ;;  %v1109_v32 = vrot.slane %v1049_v18, 1  ;;  %v2208_v47 = vrot.slane %v2207_v21, 4  ;;  %v1702_v16 = vld [vmem:[#allocation2 + $0x78] sm:$0x1] }
 0x224   : > { %v2015_v34 = vmin.f32 %v1999_v19, 6.0  ;;  %v2320_v24 = vunpack.c.l.b16 %v2203_v28  ;;  %v1185_v31 = vmul.f32 %v4029_v40, %v1166_v23  ;;  %v2016_v37 = vmin.f32 %v2000_v25, 6.0  ;;  %v1839_v23 = vld [vmem:[#allocation2 + $0x70] sm:$0xe] }
 0x225   : > { %v1108_v39 = vsel %vm1080_vm7, %v1106_v22, %v1107_v30  ;;  %v1110_v38 = vsel %vm1080_vm7, %v1107_v30, %v1109_v32  ;;  %v1186_v41 = vmul.f32 %v4289_v56, %v4029_v40  ;;  %v2213_v42 = vsel %vm4022_vm9, %v2208_v47, %v2212_v11 }
 0x226   : > { %v2031_v4 = vpack.c.bf16 %v2015_v34, %v2015_v34  ;;  %v1147_v44 = vadd.f32 %v1108_v39, %v993_v2  ;;  %v1148_v45 = vadd.f32 %v1110_v38, %v994_v6  ;;  %v2032_v57 = vpack.c.bf16 %v2016_v37, %v2016_v37  ;;  %v3237_v6 = vld [vmem:[#allocation2 + $0x70] sm:$0xff]  }
 0x227   : > { %v2321_v59 = vunpack.c.l.b16 %v2213_v42  ;;  %v1187_v29 = vmul.f32 %v4029_v40, %v1028_v7  ;;  %v1244_v50 = vrot.slane %v1185_v31, 2  ;;  %v1245_v54 = vrot.slane %v1186_v41, 2 }
 0x228   : > { %v2286_v53 = vunpack.c.l.b16 %v2031_v4  ;;  %v1335_v58 = vmul.f32 %v4350_v5, %v4056_v10  ;;  %v1336_v56 = vmul.f32 %v4353_v12, %v4056_v10  ;;  %v2287_v55 = vunpack.c.l.b16 %v2032_v57 }
 0x229   : > { %v2331_v33 = vpack.c.b16 %v2321_v59, %v2320_v24  ;;  %v1247_v60 = vrot.slane %v1187_v29, 2  ;;  %v1370_v51 = vunpack.c.l.bf16 %v1362_v46  ;;  %v1246_v61 = vsel %vm1218_vm8, %v1244_v50, %v1245_v54  ;;  %v2879_v46 = vld [vmem:[%s3887_s14 + $0x70] sm:$0xf]  ;;  %v4431_v29 = vld [vmem:[#allocation8 + $0x8] ss:$0 sm:$0xff] }
 0x22a   : > { %v1389_v17 = vmul.f32 %v4350_v5, %v4059_v14  ;;  %v1390_v62 = vmul.f32 %v4353_v12, %v4059_v14  ;;  %v1507_v63 = vunpack.c.l.bf16 %v1499_v52  ;;  %v2298_v0 = vpack.c.b16 %v2287_v55, %v2286_v53  ;;  %v2880_v53 = vld [vmem:[%s3887_s14 + $0x74] sm:$0xf] }
 0x22b   : > { %2556 = vmatmul.bf16.gmra.mxu2 %v2331_v33  ;;  %v1248_v2 = vsel %vm1218_vm8, %v1245_v54, %v1247_v60  ;;  %v1285_v3 = vadd.f32 %v1246_v61, %v1147_v44  ;;  %v1391_v49 = vmul.f32 %v4059_v14, %v1370_v51  ;;  %v1527_v13 = vmul.f32 %v4353_v12, %v4066_v20 }
 0x22c   : > { %v1286_v7 = vadd.f32 %v1248_v2, %v1148_v45  ;;  %v1447_v8 = vrot.slane %v1389_v17, 1  ;;  %v1448_v9 = vrot.slane %v1390_v62, 1  ;;  %v1526_v26 = vmul.f32 %v4066_v20, %v1507_v63  ;;  %2502 = vmatmul.bf16.gmra.mxu1 %v2298_v0  ;;  %v2881_v63 = vld [vmem:[%s3887_s14 + $0x78] sm:$0x1] }
 0x22d   : > { %v1351_v11 = vadd.f32 %v1335_v58, %v1285_v3  ;;  %v1450_v1 = vrot.slane %v1391_v49, 1  ;;  %v1528_v15 = vmul.f32 %v4066_v20, %v1370_v51  ;;  %v4414_v22 = vunpack.c.l.bf16 %v3237_v6 }
 0x22e   : > { %v1352_v18 = vadd.f32 %v1336_v56, %v1286_v7  ;;  %v1449_v19 = vsel %vm1080_vm7, %v1447_v8, %v1448_v9  ;;  %v1584_v21 = vrot.slane %v1526_v26, 2  ;;  %v1585_v30 = vrot.slane %v1527_v13, 2  ;;  %v1021_v8 = vld [vmem:[#allocation2 + $0x68] sm:$0x1] }
 0x22f   : > { %v1451_v25 = vsel %vm1080_vm7, %v1448_v9, %v1450_v1  ;;  %v1488_v28 = vadd.f32 %v1449_v19, %v1351_v11  ;;  %v1587_v32 = vrot.slane %v1528_v15, 2  ;;  %v4417_v47 = vunpack.c.h.bf16 %v3237_v6 }
 0x230   : > { %v1489_v34 = vadd.f32 %v1451_v25, %v1352_v18  ;;  %v1675_v24 = vmul.f32 %v4414_v22, %v4082_v43  ;;  %v1710_v31 = vunpack.c.l.bf16 %v1702_v16  ;;  %v1586_v37 = vsel %vm1218_vm8, %v1584_v21, %v1585_v30 }
 0x231   : > { %v1588_v39 = vsel %vm1218_vm8, %v1585_v30, %v1587_v32  ;;  %v1729_v38 = vmul.f32 %v4414_v22, %v4087_v48  ;;  %v1847_v41 = vunpack.c.l.bf16 %v1839_v23  ;;  %v1625_v4 = vadd.f32 %v1586_v37, %v1488_v28  ;;  %v1159_v28 = vld [vmem:[#allocation2 + $0x60] sm:$0xe]  ;;  %v4450_v30 = vld [vmem:[%s4665_s4] ss:$0 sm:$0xff] }
 0x232   : > { %v1626_v42 = vadd.f32 %v1588_v39, %v1489_v34  ;;  %v1676_v44 = vmul.f32 %v4417_v47, %v4082_v43  ;;  %v1730_v45 = vmul.f32 %v4417_v47, %v4087_v48  ;;  %v1731_v57 = vmul.f32 %v4087_v48, %v1710_v31 }
 0x233   : > { %v1787_v59 = vrot.slane %v1729_v38, 1  ;;  %v1866_v50 = vmul.f32 %v4431_v29, %v1847_v41  ;;  %v1867_v52 = vmul.f32 %v4431_v29, %v4417_v47  ;;  %v1691_v54 = vadd.f32 %v1675_v24, %v1625_v4 }
 0x234   : > { %v1692_v58 = vadd.f32 %v1676_v44, %v1626_v42  ;;  %v1788_v56 = vrot.slane %v1730_v45, 1  ;;  %v1868_v55 = vmul.f32 %v4431_v29, %v1710_v31  ;;  %v1790_v33 = vrot.slane %v1731_v57, 1 }
 0x235   : > { %v1924_v60 = vrot.slane %v1866_v50, 2  ;;  %v1925_v51 = vrot.slane %v1867_v52, 2  ;;  %v2215_v61 = vshrl.u32 %v2879_v46, 16  ;;  %v2218_v0 = vshll.u32 %v2879_v46, 16  ;;  %v4537_v36 = vpop.f32.mrf.mxu2 }
 0x236   : > { %v1789_v17 = vsel %vm1080_vm7, %v1787_v59, %v1788_v56  ;;  %v1927_v62 = vrot.slane %v1868_v55, 2  ;;  %v2224_v2 = vshll.u32 %v2880_v53, 16  ;;  %v1791_v3 = vsel %vm1080_vm7, %v1788_v56, %v1790_v33 }
 0x237   : > { %v1828_v49 = vadd.f32 %v1789_v17, %v1691_v54  ;;  %v1926_v6 = vsel %vm1218_vm8, %v1924_v60, %v1925_v51  ;;  %v2217_v7 = vrot.slane %v2215_v61, 4  ;;  %v1829_v9 = vadd.f32 %v1791_v3, %v1692_v58 }
 0x238   : > { %v1928_v26 = vsel %vm1218_vm8, %v1925_v51, %v1927_v62  ;;  %v2220_v11 = vrot.slane %v2218_v0, 5  ;;  %v2226_v1 = vrot.slane %v2224_v2, 5  ;;  %v2228_v15 = vshrl.u32 %v2880_v53, 16  ;;  %v1363_v62 = vld [vmem:[#allocation2 + $0x78] sm:$0x1] }
 0x239   : > { %v1965_v13 = vadd.f32 %v1926_v6, %v1828_v49  ;;  %v2234_v16 = vshll.u32 %v2881_v63, 16  ;;  %v995_v18 = vmul.f32 %v4350_v5, %v4015_v27  ;;  %v1966_v19 = vadd.f32 %v1928_v26, %v1829_v9  ;;  %v1500_v49 = vld [vmem:[#allocation2 + $0x70] sm:$0xe] }
 0x23a   : > { %v2221_v21 = vor.u32 %v2220_v11, %v2217_v7  ;;  %v996_v23 = vmul.f32 %v4353_v12, %v4015_v27  ;;  %v1029_v25 = vunpack.c.l.bf16 %v1021_v8  ;;  %v2230_v34 = vrot.slane %v2228_v15, 4 }
 0x23b   : > { %v1985_v32 = vadd.f32 %v4450_v30, %v1965_v13  ;;  %v2236_v24 = vrot.slane %v2234_v16, 5  ;;  %v1050_v31 = vmul.f32 %v4350_v5, %v4018_v35  ;;  %v1986_v37 = vadd.f32 %v4450_v30, %v1966_v19 }
 0x23c   : > { %v2222_v39 = vrot.slane %v2221_v21, 4  ;;  %v1051_v38 = vmul.f32 %v4353_v12, %v4018_v35  ;;  %v1052_v41 = vmul.f32 %v4018_v35, %v1029_v25  ;;  %v2231_v42 = vor.u32 %v2230_v34, %v2226_v1 }
 0x23d   : > { %v2001_v4 = vmax.f32 %v1985_v32, 0.0  ;;  %v1111_v44 = vrot.slane %v1050_v31, 1  ;;  %v1167_v45 = vunpack.c.l.bf16 %v1159_v28  ;;  %v2002_v46 = vmax.f32 %v1986_v37, 0.0  ;;  %v3238_v28 = vld [vmem:[#allocation2 + $0x80] sm:$0xff]  }
 0x23e   : > { %v2227_v57 = vsel %vm4022_vm9, %v2222_v39, %v2226_v1  ;;  %v1112_v59 = vrot.slane %v1051_v38, 1  ;;  %v1114_v50 = vrot.slane %v1052_v41, 1  ;;  %v2232_v5 = vrot.slane %v2231_v42, 4 }
 0x23f   : > { %v2017_v52 = vmin.f32 %v2001_v4, 6.0  ;;  %v2322_v53 = vunpack.c.l.b16 %v2227_v57  ;;  %v1188_v54 = vmul.f32 %v4029_v40, %v1167_v45  ;;  %v2018_v58 = vmin.f32 %v2002_v46, 6.0  ;;  %v1703_v4 = vld [vmem:[#allocation2 + $0x88] sm:$0x1]  ;;  %v1840_v57 = vld [vmem:[#allocation2 + $0x80] sm:$0xe] }
 0x240   : > { %v1113_v56 = vsel %vm1080_vm7, %v1111_v44, %v1112_v59  ;;  %v1115_v55 = vsel %vm1080_vm7, %v1112_v59, %v1114_v50  ;;  %v1189_v33 = vmul.f32 %v4353_v12, %v4029_v40  ;;  %v2237_v51 = vsel %vm4022_vm9, %v2232_v5, %v2236_v24 }
 0x241   : > { %v2033_v60 = vpack.c.bf16 %v2017_v52, %v2017_v52  ;;  %v1149_v61 = vadd.f32 %v1113_v56, %v995_v18  ;;  %v1150_v17 = vadd.f32 %v1115_v55, %v996_v23  ;;  %v2034_v63 = vpack.c.bf16 %v2018_v58, %v2018_v58 }
 0x242   : > { %v2323_v0 = vunpack.c.l.b16 %v2237_v51  ;;  %v1190_v2 = vmul.f32 %v4029_v40, %v1029_v25  ;;  %v1249_v3 = vrot.slane %v1188_v54, 2  ;;  %v1250_v7 = vrot.slane %v1189_v33, 2 }
 0x243   : > { %v2288_v6 = vunpack.c.l.b16 %v2033_v60  ;;  %v1337_v8 = vmul.f32 %v4414_v22, %v4056_v10  ;;  %v1338_v12 = vmul.f32 %v4417_v47, %v4056_v10  ;;  %v2289_v9 = vunpack.c.l.b16 %v2034_v63 }
 0x244   : > { %v2332_v26 = vpack.c.b16 %v2323_v0, %v2322_v53  ;;  %v1252_v11 = vrot.slane %v1190_v2, 2  ;;  %v1371_v1 = vunpack.c.l.bf16 %v1363_v62  ;;  %v1251_v13 = vsel %vm1218_vm8, %v1249_v3, %v1250_v7  ;;  %v2882_v0 = vld [vmem:[%s3887_s14 + $0x80] sm:$0xf] }
 0x245   : > { %v1392_v15 = vmul.f32 %v4414_v22, %v4059_v14  ;;  %v1393_v16 = vmul.f32 %v4417_v47, %v4059_v14  ;;  %v1508_v18 = vunpack.c.l.bf16 %v1500_v49  ;;  %v2299_v19 = vpack.c.b16 %v2289_v9, %v2288_v6 }
 0x246   : > { %2561 = vmatmul.bf16.gmra.mxu2 %v2332_v26  ;;  %v1253_v21 = vsel %vm1218_vm8, %v1250_v7, %v1252_v11  ;;  %v1287_v23 = vadd.f32 %v1251_v13, %v1149_v61  ;;  %v1394_v25 = vmul.f32 %v4059_v14, %v1371_v1  ;;  %v1530_v38 = vmul.f32 %v4417_v47, %v4066_v20  ;;  %v2883_v7 = vld [vmem:[%s3887_s14 + $0x84] sm:$0xf] }
 0x247   : > { %v1288_v32 = vadd.f32 %v1253_v21, %v1150_v17  ;;  %v1452_v34 = vrot.slane %v1392_v15, 1  ;;  %v1453_v24 = vrot.slane %v1393_v16, 1  ;;  %v1529_v31 = vmul.f32 %v4066_v20, %v1508_v18  ;;  %2507 = vmatmul.bf16.gmra.mxu1 %v2299_v19  ;;  %v2884_v19 = vld [vmem:[%s3887_s14 + $0x88] sm:$0x1]  ;;  %s4714_s14 = smov %s4713_s10 }
 0x248   : > { %v1353_v37 = vadd.f32 %v1337_v8, %v1287_v23  ;;  %v1455_v39 = vrot.slane %v1394_v25, 1  ;;  %v1531_v41 = vmul.f32 %v4066_v20, %v1371_v1  ;;  %v4485_v46 = vunpack.c.l.bf16 %v3238_v28  ;;  %p3547_p3 = scmp.lt.s32.totalorder %s3541_s3, %s4714_s14 }
 0x249   : > { %v1354_v42 = vadd.f32 %v1338_v12, %v1288_v32  ;;  %v1454_v44 = vsel %vm1080_vm7, %v1452_v34, %v1453_v24  ;;  %v1589_v45 = vrot.slane %v1529_v31, 2  ;;  %v1590_v52 = vrot.slane %v1530_v38, 2 }
 0x24a   : > { %v1456_v59 = vsel %vm1080_vm7, %v1453_v24, %v1455_v39  ;;  %v1490_v50 = vadd.f32 %v1454_v44, %v1353_v37  ;;  %v1592_v5 = vrot.slane %v1531_v41, 2  ;;  %v4488_v54 = vunpack.c.h.bf16 %v3238_v28  ;;  %v1022_v24 = vld [vmem:[#allocation2 + $0x78] sm:$0x1] }
 0x24b   : > { %v1491_v53 = vadd.f32 %v1456_v59, %v1354_v42  ;;  %v1677_v58 = vmul.f32 %v4485_v46, %v4082_v43  ;;  %v1711_v56 = vunpack.c.l.bf16 %v1703_v4  ;;  %v1591_v55 = vsel %vm1218_vm8, %v1589_v45, %v1590_v52 }
 0x24c   : > { %v1593_v33 = vsel %vm1218_vm8, %v1590_v52, %v1592_v5  ;;  %v1732_v60 = vmul.f32 %v4485_v46, %v4087_v48  ;;  %v1848_v51 = vunpack.c.l.bf16 %v1840_v57  ;;  %v1627_v61 = vadd.f32 %v1591_v55, %v1490_v50  ;;  %v1160_v52 = vld [vmem:[#allocation2 + $0x70] sm:$0xe] }
 0x24d   : > { %v1628_v17 = vadd.f32 %v1593_v33, %v1491_v53  ;;  %v1678_v62 = vmul.f32 %v4488_v54, %v4082_v43  ;;  %v1733_v63 = vmul.f32 %v4488_v54, %v4087_v48  ;;  %v1734_v2 = vmul.f32 %v4087_v48, %v1711_v56 }
 0x24e   : > { %v1792_v3 = vrot.slane %v1732_v60, 1  ;;  %v1869_v49 = vmul.f32 %v4431_v29, %v1848_v51  ;;  %v1870_v6 = vmul.f32 %v4431_v29, %v4488_v54  ;;  %v1693_v8 = vadd.f32 %v1677_v58, %v1627_v61 }
 0x24f   : > { %v1694_v12 = vadd.f32 %v1678_v62, %v1628_v17  ;;  %v1793_v9 = vrot.slane %v1733_v63, 1  ;;  %v1871_v26 = vmul.f32 %v4431_v29, %v1711_v56  ;;  %v1795_v11 = vrot.slane %v1734_v2, 1 }
 0x250   : > { %v1929_v1 = vrot.slane %v1869_v49, 2  ;;  %v1930_v13 = vrot.slane %v1870_v6, 2  ;;  %v2239_v15 = vshrl.u32 %v2882_v0, 16  ;;  %v2242_v21 = vshll.u32 %v2882_v0, 16 }
 0x251   : > { %v1794_v16 = vsel %vm1080_vm7, %v1792_v3, %v1793_v9  ;;  %v1932_v18 = vrot.slane %v1871_v26, 2  ;;  %v2248_v23 = vshll.u32 %v2883_v7, 16  ;;  %v1796_v25 = vsel %vm1080_vm7, %v1793_v9, %v1795_v11 }
 0x252   : > { %v1830_v28 = vadd.f32 %v1794_v16, %v1693_v8  ;;  %v1931_v32 = vsel %vm1218_vm8, %v1929_v1, %v1930_v13  ;;  %v2241_v34 = vrot.slane %v2239_v15, 4  ;;  %v1831_v31 = vadd.f32 %v1796_v25, %v1694_v12  ;;  %v1364_v15 = vld [vmem:[#allocation2 + $0x88] sm:$0x1] }
 0x253   : > { %v1933_v37 = vsel %vm1218_vm8, %v1930_v13, %v1932_v18  ;;  %v2244_v39 = vrot.slane %v2242_v21, 5  ;;  %v2250_v38 = vrot.slane %v2248_v23, 5  ;;  %v2252_v4 = vshrl.u32 %v2883_v7, 16  ;;  %v1501_v23 = vld [vmem:[#allocation2 + $0x80] sm:$0xe] }
 0x254   : > { %v1967_v41 = vadd.f32 %v1931_v32, %v1830_v28  ;;  %v2258_v42 = vshll.u32 %v2884_v19, 16  ;;  %v997_v44 = vmul.f32 %v4414_v22, %v4015_v27  ;;  %v1968_v45 = vadd.f32 %v1933_v37, %v1831_v31 }
 0x255   : > { %v2245_v57 = vor.u32 %v2244_v39, %v2241_v34  ;;  %v998_v59 = vmul.f32 %v4417_v47, %v4015_v27  ;;  %v1030_v50 = vunpack.c.l.bf16 %v1022_v24  ;;  %v2254_v53 = vrot.slane %v2252_v4, 4  ;;  %v2483_v34 = vpop.f32.mrf.mxu1 }
 0x256   : > { %v1987_v5 = vadd.f32 %v4450_v30, %v1967_v41  ;;  %v2260_v58 = vrot.slane %v2258_v42, 5  ;;  %v1053_v56 = vmul.f32 %v4414_v22, %v4018_v35  ;;  %v1988_v55 = vadd.f32 %v4450_v30, %v1968_v45 }
 0x257   : > { %v2246_v33 = vrot.slane %v2245_v57, 4  ;;  %v1054_v60 = vmul.f32 %v4417_v47, %v4018_v35  ;;  %v1055_v51 = vmul.f32 %v4018_v35, %v1030_v50  ;;  %v2255_v17 = vor.u32 %v2254_v53, %v2250_v38  ;;  %v3239_v57 = vld [vmem:[#allocation2 + $0x90] sm:$0xff]  }
 0x258   : > { %v2003_v61 = vmax.f32 %v1987_v5, 0.0  ;;  %v1116_v27 = vrot.slane %v1053_v56, 1  ;;  %v1168_v62 = vunpack.c.l.bf16 %v1160_v52  ;;  %v2004_v63 = vmax.f32 %v1988_v55, 0.0  ;;  %v1704_v55 = vld [vmem:[#allocation2 + $0x98] sm:$0x1] }
 0x259   : > { %v2251_v0 = vsel %vm4022_vm9, %v2246_v33, %v2250_v38  ;;  %v1117_v2 = vrot.slane %v1054_v60, 1  ;;  %v1119_v3 = vrot.slane %v1055_v51, 1  ;;  %v2256_v22 = vrot.slane %v2255_v17, 4 }
 0x25a   : > { %v2019_v49 = vmin.f32 %v2003_v61, 6.0  ;;  %v2324_v6 = vunpack.c.l.b16 %v2251_v0  ;;  %v1191_v7 = vmul.f32 %v4029_v40, %v1168_v62  ;;  %v2020_v8 = vmin.f32 %v2004_v63, 6.0  ;;  %v1841_v61 = vld [vmem:[#allocation2 + $0x90] sm:$0xe] }
 0x25b   : > { %v1118_v12 = vsel %vm1080_vm7, %v1116_v27, %v1117_v2  ;;  %v1120_v35 = vsel %vm1080_vm7, %v1117_v2, %v1119_v3  ;;  %v1192_v9 = vmul.f32 %v4417_v47, %v4029_v40  ;;  %v2261_v11 = vsel %vm4022_vm9, %v2256_v22, %v2260_v58  ;;  %v2534_v22 = vpop.f32.mrf.mxu2 }
 0x25c   : > { %v2035_v26 = vpack.c.bf16 %v2019_v49, %v2019_v49  ;;  %v1151_v1 = vadd.f32 %v1118_v12, %v997_v44  ;;  %v1152_v13 = vadd.f32 %v1120_v35, %v998_v59  ;;  %v2036_v16 = vpack.c.bf16 %v2020_v8, %v2020_v8  ;;  %v4559_v12 = vld [vmem:[%s4711_s21] ss:$0 sm:$0xff]  ;;  %s3546_s21 = scalar_lea.hbm %s4714_s14, 512 }
 0x25d   : > { %v2325_v18 = vunpack.c.l.b16 %v2261_v11  ;;  %v1193_v19 = vmul.f32 %v4029_v40, %v1030_v50  ;;  %v1254_v21 = vrot.slane %v1191_v7, 2  ;;  %v1255_v28 = vrot.slane %v1192_v9, 2  ;;  %p3548_p5 = scmp.lt.s32.totalorder %s3546_s21, %s3542_s16 }
 0x25e   : > { %v2290_v25 = vunpack.c.l.b16 %v2035_v26  ;;  %v1339_v32 = vmul.f32 %v4485_v46, %v4056_v10  ;;  %v1340_v47 = vmul.f32 %v4488_v54, %v4056_v10  ;;  %v2291_v24 = vunpack.c.l.b16 %v2036_v16 }
 0x25f   : > { %v2333_v31 = vpack.c.b16 %v2325_v18, %v2324_v6  ;;  %v1257_v37 = vrot.slane %v1193_v19, 2  ;;  %v1372_v39 = vunpack.c.l.bf16 %v1364_v15  ;;  %v1256_v38 = vsel %vm1218_vm8, %v1254_v21, %v1255_v28  ;;  %p3549_p7 = por %p3548_p5, %p3547_p3 }
 0x260   : > { %v1395_v40 = vmul.f32 %v4485_v46, %v4059_v14  ;;  %v1396_v41 = vmul.f32 %v4488_v54, %v4059_v14  ;;  %v1509_v4 = vunpack.c.l.bf16 %v1501_v23  ;;  %v2300_v42 = vpack.c.b16 %v2291_v24, %v2290_v25 }
 0x261   : > { %2566 = vmatmul.bf16.gmra.mxu2 %v2333_v31  ;;  %v1258_v10 = vsel %vm1218_vm8, %v1255_v28, %v1257_v37  ;;  %v1289_v44 = vadd.f32 %v1256_v38, %v1151_v1  ;;  %v1397_v45 = vmul.f32 %v4059_v14, %v1372_v39  ;;  %v1533_v58 = vmul.f32 %v4488_v54, %v4066_v20  ;;  %v2485_v54 = vpop.f32.mrf.mxu1  ;;  %p3550_p8 = pnand %p3549_p7, %p3545_p2 }
 0x262   : > { %v1290_v59 = vadd.f32 %v1258_v10, %v1152_v13  ;;  %v1457_v50 = vrot.slane %v1395_v40, 1  ;;  %v1458_v52 = vrot.slane %v1396_v41, 1  ;;  %v1532_v5 = vmul.f32 %v4066_v20, %v1509_v4  ;;  %2512 = vmatmul.bf16.gmra.mxu1 %v2300_v42 }
 0x263   : > { %v1355_v53 = vadd.f32 %v1339_v32, %v1289_v44  ;;  %v1460_v46 = vrot.slane %v1397_v45, 1  ;;  %v1534_v56 = vmul.f32 %v4066_v20, %v1372_v39  ;;  %v3198_v14 = vunpack.c.l.bf16 %v3239_v57 }
 0x264   : > { %v1356_v33 = vadd.f32 %v1340_v47, %v1290_v59  ;;  %v1459_v60 = vsel %vm1080_vm7, %v1457_v50, %v1458_v52  ;;  %v1594_v51 = vrot.slane %v1532_v5, 2  ;;  %v1595_v62 = vrot.slane %v1533_v58, 2 }
 0x265   : > { %v1461_v17 = vsel %vm1080_vm7, %v1458_v52, %v1460_v46  ;;  %v1492_v27 = vadd.f32 %v1459_v60, %v1355_v53  ;;  %v1597_v63 = vrot.slane %v1534_v56, 2  ;;  %v3199_v2 = vunpack.c.h.bf16 %v3239_v57 }
 0x266   : > { %v1493_v0 = vadd.f32 %v1461_v17, %v1356_v33  ;;  %v1679_v3 = vmul.f32 %v3198_v14, %v4082_v43  ;;  %v1712_v49 = vunpack.c.l.bf16 %v1704_v55  ;;  %v1596_v20 = vsel %vm1218_vm8, %v1594_v51, %v1595_v62 }
 0x267   : > { %v1598_v6 = vsel %vm1218_vm8, %v1595_v62, %v1597_v63  ;;  %v1735_v7 = vmul.f32 %v3198_v14, %v4087_v48  ;;  %v1849_v8 = vunpack.c.l.bf16 %v1841_v61  ;;  %v1629_v35 = vadd.f32 %v1596_v20, %v1492_v27 }
 0x268   : > { %v1630_v9 = vadd.f32 %v1598_v6, %v1493_v0  ;;  %v1680_v26 = vmul.f32 %v3199_v2, %v4082_v43  ;;  %v1736_v11 = vmul.f32 %v3199_v2, %v4087_v48  ;;  %v1737_v1 = vmul.f32 %v4087_v48, %v1712_v49 }
 0x269   : > { %v1797_v13 = vrot.slane %v1735_v7, 1  ;;  %v1872_v15 = vmul.f32 %v4431_v29, %v1849_v8  ;;  %v1873_v16 = vmul.f32 %v4431_v29, %v3199_v2  ;;  %v1695_v18 = vadd.f32 %v1679_v3, %v1629_v35  ;;  %v2488_v4 = vpop.f32.mrf.mxu1 }
 0x26a   : > { %v1696_v19 = vadd.f32 %v1680_v26, %v1630_v9  ;;  %v1798_v21 = vrot.slane %v1736_v11, 1  ;;  %v1874_v23 = vmul.f32 %v4431_v29, %v1712_v49  ;;  %v1800_v25 = vrot.slane %v1737_v1, 1 }
 0x26b   : > { %v1934_v28 = vrot.slane %v1872_v15, 2  ;;  %v1935_v32 = vrot.slane %v1873_v16, 2  ;;  %v2484_v43 = vadd.f32 %v4559_v12, %v2483_v34  ;;  %v2486_v24 = vadd.f32 %v4559_v12, %v2485_v54  ;;  %v2537_v34 = vpop.f32.mrf.mxu2 }
 0x26c   : > { %v1799_v47 = vsel %vm1080_vm7, %v1797_v13, %v1798_v21  ;;  %v1937_v48 = vrot.slane %v1874_v23, 2  ;;  %v1801_v31 = vsel %vm1080_vm7, %v1798_v21, %v1800_v25  ;;  %v2489_v10 = vadd.f32 %v4559_v12, %v2488_v4 }
 0x26d   : > { %v1832_v37 = vadd.f32 %v1799_v47, %v1695_v18  ;;  %v1936_v39 = vsel %vm1218_vm8, %v1934_v28, %v1935_v32  ;;  %v2533_v29 = vadd.f32 %v4537_v36, %v2484_v43  ;;  %v1833_v38 = vadd.f32 %v1801_v31, %v1696_v19 }
 0x26e   : > { %v1938_v40 = vsel %vm1218_vm8, %v1935_v32, %v1937_v48  ;;  %v2535_v41 = vadd.f32 %v2534_v22, %v2486_v24  ;;  %v2538_v57 = vadd.f32 %v2537_v34, %v2489_v10 }
 0x26f   : > { %v1969_v42 = vadd.f32 %v1936_v39, %v1832_v37  ;;  %2572 = vst [vmem:[%s4005_s12] sm:$0xff] %v2533_v29  ;;  %v1970_v44 = vadd.f32 %v1938_v40, %v1833_v38 }
 0x270   : > { %2573 = vst [vmem:[%s4005_s12 + $0x8] sm:$0xff] %v2535_v41 }
 0x271   : > { %v1989_v45 = vadd.f32 %v4450_v30, %v1969_v42  ;;  %v1990_v59 = vadd.f32 %v4450_v30, %v1970_v44  ;;  %2574 = vst [vmem:[%s4005_s12 + $0x10] sm:$0xff] %v2538_v57  ;;  %v2490_v53 = vpop.f32.mrf.mxu1 }
 0x272   : > { %v2491_v56 = vadd.f32 %v4559_v12, %v2490_v53 }
 0x273   : > { %v2005_v50 = vmax.f32 %v1989_v45, 0.0  ;;  %v2006_v36 = vmax.f32 %v1990_v59, 0.0  ;;  %v2539_v46 = vpop.f32.mrf.mxu2 }
 0x274   : > { %v2540_v60 = vadd.f32 %v2539_v46, %v2491_v56 }
 0x275   : > { %v2021_v52 = vmin.f32 %v2005_v50, 6.0  ;;  %v2022_v5 = vmin.f32 %v2006_v36, 6.0 }
 0x276   : > { %2575 = vst [vmem:[%s4005_s12 + $0x18] sm:$0xff] %v2540_v60 }
 0x277   : > { %v2037_v58 = vpack.c.bf16 %v2021_v52, %v2021_v52  ;;  %v2038_v55 = vpack.c.bf16 %v2022_v5, %v2022_v5 }
 0x279   : > { %v2292_v33 = vunpack.c.l.b16 %v2037_v58  ;;  %v2293_v51 = vunpack.c.l.b16 %v2038_v55  ;;  %v2493_v30 = vpop.f32.mrf.mxu1 }
 0x27a   : > { %v2494_v17 = vadd.f32 %v4559_v12, %v2493_v30 }
 0x27b   : > { %v2301_v14 = vpack.c.b16 %v2293_v51, %v2292_v33  ;;  %v2542_v61 = vpop.f32.mrf.mxu2 }
 0x27c   : > { %v2543_v27 = vadd.f32 %v2542_v61, %v2494_v17 }
 0x27d   : > { %2517 = vmatmul.bf16.gmra.mxu1 %v2301_v14 }
 0x27e   : > { %2576 = vst [vmem:[%s4005_s12 + $0x20] sm:$0xff] %v2543_v27 }
 0x281   : > { %v2495_v62 = vpop.f32.mrf.mxu1 }
 0x282   : > { %v2496_v0 = vadd.f32 %v4559_v12, %v2495_v62 }
 0x283   : > { %v2544_v63 = vpop.f32.mrf.mxu2 }
 0x284   : > { %v2545_v2 = vadd.f32 %v2544_v63, %v2496_v0 }
 0x286   : > { %2577 = vst [vmem:[%s4005_s12 + $0x28] sm:$0xff] %v2545_v2 }
 0x28b   : > { %v2547_v3 = vpop.f32.mrf.mxu2 }
 0x28e   : > { %v2498_v49 = vpop.f32.mrf.mxu1 }
 0x28f   : > { %v2499_v54 = vadd.f32 %v4559_v12, %v2498_v49 }
 0x291   : > { %v2548_v22 = vadd.f32 %v2547_v3, %v2499_v54 }
 0x293   : > { %2578 = vst [vmem:[%s4005_s12 + $0x30] sm:$0xff] %v2548_v22  ;;  %v2549_v6 = vpop.f32.mrf.mxu2 }
 0x296   : > { %v2500_v20 = vpop.f32.mrf.mxu1 }
 0x297   : > { %v2501_v7 = vadd.f32 %v4559_v12, %v2500_v20 }
 0x299   : > { %v2550_v8 = vadd.f32 %v2549_v6, %v2501_v7 }
 0x29b   : > { %2579 = vst [vmem:[%s4005_s12 + $0x38] sm:$0xff] %v2550_v8  ;;  %v2552_v35 = vpop.f32.mrf.mxu2 }
 0x2a3   : > { %v2554_v13 = vpop.f32.mrf.mxu2 }
 0x2a9   : > { %v2503_v9 = vpop.f32.mrf.mxu1 }
 0x2aa   : > { %v2504_v26 = vadd.f32 %v4559_v12, %v2503_v9 }
 0x2ac   : > { %v2553_v11 = vadd.f32 %v2552_v35, %v2504_v26 }
 0x2ae   : > { %2580 = vst [vmem:[%s4005_s12 + $0x40] sm:$0xff] %v2553_v11  ;;  %v2557_v18 = vpop.f32.mrf.mxu2 }
 0x2b1   : > { %v2505_v1 = vpop.f32.mrf.mxu1 }
 0x2b2   : > { %v2506_v15 = vadd.f32 %v4559_v12, %v2505_v1 }
 0x2b4   : > { %v2555_v16 = vadd.f32 %v2554_v13, %v2506_v15 }
 0x2b6   : > { %2581 = vst [vmem:[%s4005_s12 + $0x48] sm:$0xff] %v2555_v16  ;;  %v2559_v28 = vpop.f32.mrf.mxu2 }
 0x2c4   : > { %v2508_v19 = vpop.f32.mrf.mxu1 }
 0x2c5   : > { %v2509_v21 = vadd.f32 %v4559_v12, %v2508_v19 }
 0x2c7   : > { %v2558_v23 = vadd.f32 %v2557_v18, %v2509_v21 }
 0x2c9   : > { %2582 = vst [vmem:[%s4005_s12 + $0x50] sm:$0xff] %v2558_v23  ;;  %v2562_v47 = vpop.f32.mrf.mxu2 }
 0x2cc   : > { %v2510_v25 = vpop.f32.mrf.mxu1 }
 0x2cd   : > { %v2511_v32 = vadd.f32 %v4559_v12, %v2510_v25 }
 0x2cf   : > { %v2560_v43 = vadd.f32 %v2559_v28, %v2511_v32 }
 0x2d1   : > { %2583 = vst [vmem:[%s4005_s12 + $0x58] sm:$0xff] %v2560_v43  ;;  %v2564_v39 = vpop.f32.mrf.mxu2 }
 0x2df   : > { %v2513_v48 = vpop.f32.mrf.mxu1 }
 0x2e0   : > { %v2514_v24 = vadd.f32 %v4559_v12, %v2513_v48 }
 0x2e2   : > { %v2563_v31 = vadd.f32 %v2562_v47, %v2514_v24 }
 0x2e4   : > { %2584 = vst [vmem:[%s4005_s12 + $0x60] sm:$0xff] %v2563_v31  ;;  %v2567_v40 = vpop.f32.mrf.mxu2 }
 0x2e7   : > { %v2515_v37 = vpop.f32.mrf.mxu1 }
 0x2e8   : > { %v2516_v29 = vadd.f32 %v4559_v12, %v2515_v37 }
 0x2ea   : > { %v2565_v38 = vadd.f32 %v2564_v39, %v2516_v29 }
 0x2ec   : > { %2585 = vst [vmem:[%s4005_s12 + $0x68] sm:$0xff] %v2565_v38  ;;  %v2569_v10 = vpop.f32.mrf.mxu2 }
 0x2fa   : > { %v2518_v41 = vpop.f32.mrf.mxu1 }
 0x2fb   : > { %v2519_v4 = vadd.f32 %v4559_v12, %v2518_v41 }
 0x2fd   : > { %v2568_v34 = vadd.f32 %v2567_v40, %v2519_v4 }
 0x2ff   : > { %2586 = vst [vmem:[%s4005_s12 + $0x70] sm:$0xff] %v2568_v34 }
 0x302   : > { %v2520_v42 = vpop.f32.mrf.mxu1 }
 0x303   : > { %v2521_v44 = vadd.f32 %v4559_v12, %v2520_v42 }
 0x305   : > { %v2570_v45 = vadd.f32 %v2569_v10, %v2521_v44 }
 0x307   : > { %2587 = vst [vmem:[%s4005_s12 + $0x78] sm:$0xff] %v2570_v45 }
 0x308   : > { %3553 = shalt.err (!%p3550_p8)
}
 0x309   : > { %s3667_s6 = smov 128   ;;  %s3668_s12 = smov 8  }
 0x30a   : > { %3273 = dma.vmem_to_hbm [thread:$0]  (%p3779_p6), %s2605_s13, 2048, %s2607_s1, %s2589_s30, %s3667_s6, %s3667_s6, %s3668_s12  }
 0x30b PF: > { %s4716_s5 = sld [smem:[#allocation16_spill]]  ;;  %p3300_p9 = scmp.ge.s32.totalorder %s3656_s11, 2 }
 0x30d   : > { %p3290_p12 = pnand %p3300_p9, %p3785_p10 }
 0x30f   : > { %p3291_p13 = pneg %p3290_p12 }
 0x311   : > { %s2621_s7 = sand.u32 1, %s4716_s5  }
 0x312   : > { %s2622_s9 = scalar_lea.sflag [#allocation5], %s2621_s7 }
 0x313   : > { %3611 = dma.done.wait (%p3291_p13), %s2622_s9, 2048  }
 0x314   : > { %3613 = vsyncadd (%p3291_p13), %s2622_s9, 4294965248  ;;  %s25_s11 = sadd.s32 1, %s3656_s11   ;;  %s4718_s30 = sld [smem:[#allocation18_spill]] }
 0x315   : > { %p22_p1 = scmp.ge.s32.totalorder %s25_s11, 6   ;;  %s4719_s8 = sld [smem:[#allocation19_spill]] }
 0x316   : > { %s4720_s9 = sld [smem:[#allocation22_spill]]  ;;  %s4722_s24 = smov %s3620_s25 }
 0x317   : > { %s4721_s10 = sld [smem:[#allocation23_spill]]  ;;  %s4723_s25 = smov %s3624_s26 }
 0x318   : > { %s4724_s26 = smov %s3849_s20  ;;  %s4725_s27 = smov %s3632_s28 }
 0x319   : > { %s4726_s28 = smov %s3636_s29  ;;  %s4727_s29 = smov %s3846_s19 }
 0x31a   :  { %24 = sbr.rel (!%p22_p1) target bundleno = 17 (0x11), region = 118 }
 0x31f   :  { %2628 = vsyncpa [#allocation4], 1 }
 0x320   :  { %2630 = vsyncpa [#allocation4 + $0x1], 1 }
 0x321   :  { %2631 = vsyncpa [#allocation7], 1 }
 0x322   :  { %2632 = vsyncpa [#allocation10], 1 }
 0x323   :  { %2633 = vsyncpa [#allocation5], 1 }
 0x324   :  { %2635 = vsyncpa [#allocation5 + $0x1], 1 }

</bundles_post_ra>
